<compile_context>
chip_gen: v7x
topology: tpu7x:2x2x1
jax: 0.10.0
libtpu: 0.0.40
codegen_flags: <defaults>
</compile_context>

<pallas_src>
import functools

import jax
import jax.numpy as jnp
from jax.experimental import pallas as pl
from jax.experimental.pallas import tpu as pltpu


IN_FEATURES = 5
OUT_FEATURES = 3
UNITS = 50
DEPTH = 4  # 3 hidden (Linear + softplus) layers, then final Linear


def _softplus(v):
    # Matches torch.nn.Softplus(beta=1, threshold=20):
    #   x > 20 -> x ; else log(1 + exp(x))
    return jnp.where(v > 20.0, v, jnp.log1p(jnp.exp(jnp.minimum(v, 20.0))))


def spectralnet_kernel(x_ref,
                       w1_ref, b1_ref,
                       w2_ref, b2_ref,
                       w3_ref, b3_ref,
                       w4_ref, b4_ref,
                       o_ref):
    # Feature-major: x_ref is (in_features, block_b); batch on the lane dim.
    h = x_ref[...].astype(jnp.float32)

    # hidden layer 1: (units, in) @ (in, Bt) -> (units, Bt), + bias, softplus
    h = jnp.dot(w1_ref[...], h, preferred_element_type=jnp.float32) + b1_ref[...]
    h = _softplus(h)
    # hidden layer 2
    h = jnp.dot(w2_ref[...], h, preferred_element_type=jnp.float32) + b2_ref[...]
    h = _softplus(h)
    # hidden layer 3
    h = jnp.dot(w3_ref[...], h, preferred_element_type=jnp.float32) + b3_ref[...]
    h = _softplus(h)
    # output layer: (out, units) @ (units, Bt) -> (out, Bt), no activation
    h = jnp.dot(w4_ref[...], h, preferred_element_type=jnp.float32) + b4_ref[...]

    o_ref[...] = h.astype(o_ref.dtype)


@functools.partial(jax.jit, static_argnames=("block_b",))
def spectralnet_forward(x, params, *, block_b=512):
    """x: (B, in_features) float32.
    params: list of (W, b) with W=(out, in) [PyTorch-native] and b=(out, 1)."""
    B, F = x.shape
    assert F == IN_FEATURES

    (w1, b1), (w2, b2), (w3, b3), (w4, b4) = params

    # Feature-major activations: (in_features, B); batch -> lane dim.
    xt = x.T
    num_tiles = pl.cdiv(B, block_b)
    b_padded = num_tiles * block_b
    if b_padded != B:
        # Zero-pad the batch (lane) dim; padded columns are sliced off below.
        xt = jnp.pad(xt, ((0, 0), (0, b_padded - B)))

    # Weights/biases: one full block each, constant across the batch grid
    # (resident in VMEM for the whole kernel).
    def full_spec(shape):
        return pl.BlockSpec(shape, lambda i: (0, 0))

    grid = (num_tiles,)

    out_t = pl.pallas_call(
        spectralnet_kernel,
        out_shape=jax.ShapeDtypeStruct((OUT_FEATURES, b_padded), jnp.float32),
        grid_spec=pltpu.PrefetchScalarGridSpec(
            num_scalar_prefetch=0,
            grid=grid,
            in_specs=[
                pl.BlockSpec((IN_FEATURES, block_b), lambda i: (0, i)),
                full_spec(w1.shape), full_spec(b1.shape),
                full_spec(w2.shape), full_spec(b2.shape),
                full_spec(w3.shape), full_spec(b3.shape),
                full_spec(w4.shape), full_spec(b4.shape),
            ],
            out_specs=pl.BlockSpec((OUT_FEATURES, block_b), lambda i: (0, i)),
        ),
        compiler_params=pltpu.CompilerParams(
            dimension_semantics=("parallel",)),
    )(xt, w1, b1, w2, b2, w3, b3, w4, b4)

    # Back to (B, out_features); drop batch padding.
    return out_t[:, :B].T


def init_params(key):
    """Deterministic init mimicking nn.Linear default: U(-1/sqrt(fan_in), 1/sqrt(fan_in)).

    Weights are PyTorch-native (out, in); biases are (out, 1) for lane broadcast.
    """
    dims = [IN_FEATURES, UNITS, UNITS, UNITS, OUT_FEATURES]
    params = []
    for li in range(DEPTH):
        fan_in, fan_out = dims[li], dims[li + 1]
        key, kw, kb = jax.random.split(key, 3)
        bound = 1.0 / jnp.sqrt(float(fan_in))
        w = jax.random.uniform(kw, (fan_out, fan_in), jnp.float32, -bound, bound)
        b = jax.random.uniform(kb, (fan_out, 1), jnp.float32, -bound, bound)
        params.append((w, b))
    return params


def reference_forward(x, params):
    h = x
    for li, (w, b) in enumerate(params):
        h = h @ w.T + b.reshape(1, -1)
        if li < DEPTH - 1:
            h = jnp.where(h > 20.0, h, jnp.log1p(jnp.exp(jnp.minimum(h, 20.0))))
    return h


if __name__ == "__main__":
    key = jax.random.PRNGKey(0)
    kx, kp = jax.random.split(key)

    # Small example batch; not a multiple of block_b -> exercises the
    # cdiv + padding path. (For real workloads keep B large so the grid has
    # >= 2 steps and both v7x TensorCores are used.)
    B = 100
    x = jax.random.normal(kx, (B, IN_FEATURES), jnp.float32)
    params = init_params(kp)

    out = spectralnet_forward(x, params, block_b=512)
    out = jax.block_until_ready(out)

    ref = reference_forward(x, params)
    assert out.shape == (B, OUT_FEATURES)
    assert jnp.allclose(out, ref, atol=1e-4, rtol=1e-4), "mismatch vs reference"

    # TODO(synk): rotate()/update_ortho_para() (QR / Cholesky / matrix inverse)
    # are training-time utilities outside forward(); not kernelized.
    print("KERNEL_OK")
</pallas_src>

<mosaic_0001>
module attributes {stable_mosaic.version = 11 : i64} {
  func.func @spectralnet_kernel(%arg0: i32, %arg1: memref<5x512xf32, #tpu.memory_space<vmem>>, %arg2: memref<50x5xf32, #tpu.memory_space<vmem>>, %arg3: memref<50x1xf32, #tpu.memory_space<vmem>>, %arg4: memref<50x50xf32, #tpu.memory_space<vmem>>, %arg5: memref<50x1xf32, #tpu.memory_space<vmem>>, %arg6: memref<50x50xf32, #tpu.memory_space<vmem>>, %arg7: memref<50x1xf32, #tpu.memory_space<vmem>>, %arg8: memref<3x50xf32, #tpu.memory_space<vmem>>, %arg9: memref<3x1xf32, #tpu.memory_space<vmem>>, %arg10: memref<3x512xf32, #tpu.memory_space<vmem>>) attributes {dimension_semantics = [#tpu.dimension_semantics<parallel>], iteration_bounds = array<i64: 1>, scalar_prefetch = 0 : i64, scratch_operands = 0 : i64, tpu.core_type = #tpu.core_type<tc>, window_params = [{transform_indices = @transform_0, window_bounds = array<i64: 5, 512>}, {pipeline_mode = #tpu.pipeline_mode<synchronous>, transform_indices = @transform_1, window_bounds = array<i64: 50, 5>}, {pipeline_mode = #tpu.pipeline_mode<synchronous>, transform_indices = @transform_2, window_bounds = array<i64: 50, 1>}, {pipeline_mode = #tpu.pipeline_mode<synchronous>, transform_indices = @transform_3, window_bounds = array<i64: 50, 50>}, {pipeline_mode = #tpu.pipeline_mode<synchronous>, transform_indices = @transform_4, window_bounds = array<i64: 50, 1>}, {pipeline_mode = #tpu.pipeline_mode<synchronous>, transform_indices = @transform_5, window_bounds = array<i64: 50, 50>}, {pipeline_mode = #tpu.pipeline_mode<synchronous>, transform_indices = @transform_6, window_bounds = array<i64: 50, 1>}, {pipeline_mode = #tpu.pipeline_mode<synchronous>, transform_indices = @transform_7, window_bounds = array<i64: 3, 50>}, {pipeline_mode = #tpu.pipeline_mode<synchronous>, transform_indices = @transform_8, window_bounds = array<i64: 3, 1>}, {transform_indices = @transform_9, window_bounds = array<i64: 3, 512>}]} {
    %c0 = arith.constant 0 : index
    %c0_0 = arith.constant 0 : index
    %0 = vector.load %arg1[%c0, %c0_0] : memref<5x512xf32, #tpu.memory_space<vmem>>, vector<5x512xf32>
    %c0_1 = arith.constant 0 : index
    %c0_2 = arith.constant 0 : index
    %1 = vector.load %arg2[%c0_1, %c0_2] : memref<50x5xf32, #tpu.memory_space<vmem>>, vector<50x5xf32>
    %cst = arith.constant dense<0.000000e+00> : vector<50x512xf32>
    %2 = tpu.matmul %1, %0, %cst {dimension_numbers = #tpu.dot_dimension_numbers<[1], [0], [0], [1], [0, 0, 1, 1], [], []>} : vector<50x5xf32>, vector<5x512xf32>, vector<50x512xf32> -> vector<50x512xf32>
    %c0_3 = arith.constant 0 : index
    %c0_4 = arith.constant 0 : index
    %3 = vector.load %arg3[%c0_3, %c0_4] : memref<50x1xf32, #tpu.memory_space<vmem>>, vector<50x1xf32>
    %4 = vector.broadcast %3 : vector<50x1xf32> to vector<50x512xf32>
    %5 = arith.addf %2, %4 : vector<50x512xf32>
    %cst_5 = arith.constant 2.000000e+01 : f32
    %6 = vector.broadcast %cst_5 : f32 to vector<50x512xf32>
    %7 = arith.cmpf ogt, %5, %6 : vector<50x512xf32>
    %cst_6 = arith.constant 2.000000e+01 : f32
    %8 = vector.broadcast %cst_6 : f32 to vector<50x512xf32>
    %9 = arith.minimumf %5, %8 : vector<50x512xf32>
    %10 = math.exp %9 : vector<50x512xf32>
    %11 = math.log1p %10 : vector<50x512xf32>
    %12 = arith.select %7, %5, %11 : vector<50x512xi1>, vector<50x512xf32>
    %c0_7 = arith.constant 0 : index
    %c0_8 = arith.constant 0 : index
    %13 = vector.load %arg4[%c0_7, %c0_8] : memref<50x50xf32, #tpu.memory_space<vmem>>, vector<50x50xf32>
    %cst_9 = arith.constant dense<0.000000e+00> : vector<50x512xf32>
    %14 = tpu.matmul %13, %12, %cst_9 {dimension_numbers = #tpu.dot_dimension_numbers<[1], [0], [0], [1], [0, 0, 1, 1], [], []>} : vector<50x50xf32>, vector<50x512xf32>, vector<50x512xf32> -> vector<50x512xf32>
    %c0_10 = arith.constant 0 : index
    %c0_11 = arith.constant 0 : index
    %15 = vector.load %arg5[%c0_10, %c0_11] : memref<50x1xf32, #tpu.memory_space<vmem>>, vector<50x1xf32>
    %16 = vector.broadcast %15 : vector<50x1xf32> to vector<50x512xf32>
    %17 = arith.addf %14, %16 : vector<50x512xf32>
    %cst_12 = arith.constant 2.000000e+01 : f32
    %18 = vector.broadcast %cst_12 : f32 to vector<50x512xf32>
    %19 = arith.cmpf ogt, %17, %18 : vector<50x512xf32>
    %cst_13 = arith.constant 2.000000e+01 : f32
    %20 = vector.broadcast %cst_13 : f32 to vector<50x512xf32>
    %21 = arith.minimumf %17, %20 : vector<50x512xf32>
    %22 = math.exp %21 : vector<50x512xf32>
    %23 = math.log1p %22 : vector<50x512xf32>
    %24 = arith.select %19, %17, %23 : vector<50x512xi1>, vector<50x512xf32>
    %c0_14 = arith.constant 0 : index
    %c0_15 = arith.constant 0 : index
    %25 = vector.load %arg6[%c0_14, %c0_15] : memref<50x50xf32, #tpu.memory_space<vmem>>, vector<50x50xf32>
    %cst_16 = arith.constant dense<0.000000e+00> : vector<50x512xf32>
    %26 = tpu.matmul %25, %24, %cst_16 {dimension_numbers = #tpu.dot_dimension_numbers<[1], [0], [0], [1], [0, 0, 1, 1], [], []>} : vector<50x50xf32>, vector<50x512xf32>, vector<50x512xf32> -> vector<50x512xf32>
    %c0_17 = arith.constant 0 : index
    %c0_18 = arith.constant 0 : index
    %27 = vector.load %arg7[%c0_17, %c0_18] : memref<50x1xf32, #tpu.memory_space<vmem>>, vector<50x1xf32>
    %28 = vector.broadcast %27 : vector<50x1xf32> to vector<50x512xf32>
    %29 = arith.addf %26, %28 : vector<50x512xf32>
    %cst_19 = arith.constant 2.000000e+01 : f32
    %30 = vector.broadcast %cst_19 : f32 to vector<50x512xf32>
    %31 = arith.cmpf ogt, %29, %30 : vector<50x512xf32>
    %cst_20 = arith.constant 2.000000e+01 : f32
    %32 = vector.broadcast %cst_20 : f32 to vector<50x512xf32>
    %33 = arith.minimumf %29, %32 : vector<50x512xf32>
    %34 = math.exp %33 : vector<50x512xf32>
    %35 = math.log1p %34 : vector<50x512xf32>
    %36 = arith.select %31, %29, %35 : vector<50x512xi1>, vector<50x512xf32>
    %c0_21 = arith.constant 0 : index
    %c0_22 = arith.constant 0 : index
    %37 = vector.load %arg8[%c0_21, %c0_22] : memref<3x50xf32, #tpu.memory_space<vmem>>, vector<3x50xf32>
    %cst_23 = arith.constant dense<0.000000e+00> : vector<3x512xf32>
    %38 = tpu.matmul %37, %36, %cst_23 {dimension_numbers = #tpu.dot_dimension_numbers<[1], [0], [0], [1], [0, 0, 1, 1], [], []>} : vector<3x50xf32>, vector<50x512xf32>, vector<3x512xf32> -> vector<3x512xf32>
    %c0_24 = arith.constant 0 : index
    %c0_25 = arith.constant 0 : index
    %39 = vector.load %arg9[%c0_24, %c0_25] : memref<3x1xf32, #tpu.memory_space<vmem>>, vector<3x1xf32>
    %40 = vector.broadcast %39 : vector<3x1xf32> to vector<3x512xf32>
    %41 = arith.addf %38, %40 : vector<3x512xf32>
    %c0_26 = arith.constant 0 : index
    %c0_27 = arith.constant 0 : index
    %42 = vector.load %arg10[%c0_26, %c0_27] : memref<3x512xf32, #tpu.memory_space<vmem>>, vector<3x512xf32>
    tpu.vector_store %arg10[%c0_26, %c0_27], %41 {strides = array<i32>} : memref<3x512xf32, #tpu.memory_space<vmem>>, vector<3x512xf32>,
    return
  }
  func.func @transform_0(%arg0: i32) -> (i32, i32) {
    %c0_i32 = arith.constant 0 : i32
    %c0_i32_0 = arith.constant 0 : i32
    return %c0_i32, %arg0 : i32, i32
  }
  func.func @transform_1(%arg0: i32) -> (i32, i32) {
    %c0_i32 = arith.constant 0 : i32
    %c0_i32_0 = arith.constant 0 : i32
    %c0_i32_1 = arith.constant 0 : i32
    return %c0_i32, %c0_i32_0 : i32, i32
  }
  func.func @transform_2(%arg0: i32) -> (i32, i32) {
    %c0_i32 = arith.constant 0 : i32
    %c0_i32_0 = arith.constant 0 : i32
    %c0_i32_1 = arith.constant 0 : i32
    return %c0_i32, %c0_i32_0 : i32, i32
  }
  func.func @transform_3(%arg0: i32) -> (i32, i32) {
    %c0_i32 = arith.constant 0 : i32
    %c0_i32_0 = arith.constant 0 : i32
    %c0_i32_1 = arith.constant 0 : i32
    return %c0_i32, %c0_i32_0 : i32, i32
  }
  func.func @transform_4(%arg0: i32) -> (i32, i32) {
    %c0_i32 = arith.constant 0 : i32
    %c0_i32_0 = arith.constant 0 : i32
    %c0_i32_1 = arith.constant 0 : i32
    return %c0_i32, %c0_i32_0 : i32, i32
  }
  func.func @transform_5(%arg0: i32) -> (i32, i32) {
    %c0_i32 = arith.constant 0 : i32
    %c0_i32_0 = arith.constant 0 : i32
    %c0_i32_1 = arith.constant 0 : i32
    return %c0_i32, %c0_i32_0 : i32, i32
  }
  func.func @transform_6(%arg0: i32) -> (i32, i32) {
    %c0_i32 = arith.constant 0 : i32
    %c0_i32_0 = arith.constant 0 : i32
    %c0_i32_1 = arith.constant 0 : i32
    return %c0_i32, %c0_i32_0 : i32, i32
  }
  func.func @transform_7(%arg0: i32) -> (i32, i32) {
    %c0_i32 = arith.constant 0 : i32
    %c0_i32_0 = arith.constant 0 : i32
    %c0_i32_1 = arith.constant 0 : i32
    return %c0_i32, %c0_i32_0 : i32, i32
  }
  func.func @transform_8(%arg0: i32) -> (i32, i32) {
    %c0_i32 = arith.constant 0 : i32
    %c0_i32_0 = arith.constant 0 : i32
    %c0_i32_1 = arith.constant 0 : i32
    return %c0_i32, %c0_i32_0 : i32, i32
  }
  func.func @transform_9(%arg0: i32) -> (i32, i32) {
    %c0_i32 = arith.constant 0 : i32
    %c0_i32_0 = arith.constant 0 : i32
    return %c0_i32, %arg0 : i32, i32
  }
}

</mosaic_0001>

<bundles_post_ra>
// kernel: spectralnet_forward.1
= control target key start
LH: loop header
LB: loop body
LE: loop exit
PB: predicated region body
PF: predicated region fallthrough
CT: control target
= control target key end

     0   :  { %vm107_vm0 = vcmask 1044480   ;;  %vm85_vm1 = vcmask 39936   ;;  %v4864_v3 = vmov 0.0   ;;  %v2755_v9 = vmov 0   ;;  %s4854_s0 = inlined_call_operand.vmem [shape: f32[5,512], index: 0, kind: input, shape index: {}]   ;;  %s4855_s1 = inlined_call_operand.vmem [shape: f32[50,5], index: 1, kind: input, shape index: {}]   ;;  %s4856_s2 = inlined_call_operand.vmem [shape: f32[50,1], index: 2, kind: input, shape index: {}]   ;;  %s4857_s4 = inlined_call_operand.vmem [shape: f32[50,1], index: 4, kind: input, shape index: {}]   ;;  %s4858_s6 = inlined_call_operand.vmem [shape: f32[50,1], index: 6, kind: input, shape index: {}]   ;;  %s4859_s8 = inlined_call_operand.vmem [shape: f32[3,1], index: 8, kind: input, shape index: {}]   ;;  %s4860_s3 = inlined_call_operand.vmem [shape: f32[50,50], index: 3, kind: input, shape index: {}]   ;;  %s4861_s5 = inlined_call_operand.vmem [shape: f32[50,50], index: 5, kind: input, shape index: {}]   ;;  %s4862_s7 = inlined_call_operand.vmem [shape: f32[3,50], index: 7, kind: input, shape index: {}]   ;;  %s4863_s9 = inlined_call_operand.vmem [shape: f32[3,512], index: 9, kind: output, shape index: {}]  }
   0x1   :  { %v33_v0 = vld [vmem:[%s4854_s0 + $0x8] sm:$0x1f]  ;;  %v35_v1 = vld [vmem:[%s4854_s0 + $0x18] sm:$0x1f]  ;;  %v32_v2 = vld [vmem:[%s4854_s0] sm:$0x1f]  ;;  %184 = vmatprep.mubr.f32.mxu0 %v4864_v3  ;;  %291 = vmatprep.mubr.f32.mxu1 %v4864_v3 }
   0x2   :  { %2282 = vmatprep.subr.msk.mxu0 %vm107_vm0, %v33_v0  ;;  %2291 = vmatprep.subr.msk.mxu1 %vm107_vm0, %v35_v1  ;;  %v34_v4 = vld [vmem:[%s4854_s0 + $0x10] sm:$0x1f]  ;;  %v36_v5 = vld [vmem:[%s4855_s1] sm:$0xff]  ;;  %v37_v7 = vld [vmem:[%s4855_s1 + $0x8] sm:$0xff] }
   0x3   :  { %2283 = vmatpush1.msk.msra.mxu0 %vm107_vm0, %v32_v2  ;;  %2292 = vmatpush1.msk.msra.mxu1 %vm107_vm0, %v34_v4  ;;  %v43_v6 = vld [vmem:[%s4856_s2] sm:$0xff]  ;;  %v45_v8 = vld [vmem:[%s4856_s2 + $0x10] sm:$0xff]  ;;  %v44_v10 = vld [vmem:[%s4856_s2 + $0x8] sm:$0xff] }
   0x4   :  { %2284 = vmatmul.mubr.msk.f32.vlgmr.msra.gmra.mrb[0].mxu0 %vm85_vm1, %v36_v5  ;;  %2293 = vmatmul.mubr.msk.f32.vlgmr.msra.gmra.mrb[0].mxu1 %vm85_vm1, %v36_v5  ;;  %v46_v11 = vld [vmem:[%s4856_s2 + $0x18] sm:$0xff]  ;;  %v38_v12 = vld [vmem:[%s4855_s1 + $0x10] sm:$0xff]  ;;  %v47_v13 = vld [vmem:[%s4856_s2 + $0x20] sm:$0xff] }
   0x5   :  { %190 = vmatprep.mubr.f32.mxu0 %v4864_v3  ;;  %297 = vmatprep.mubr.f32.mxu1 %v4864_v3  ;;  %v48_v14 = vld [vmem:[%s4856_s2 + $0x28] sm:$0xff]  ;;  %v39_v15 = vld [vmem:[%s4855_s1 + $0x18] sm:$0xff]  ;;  %v49_v16 = vld [vmem:[%s4856_s2 + $0x30] sm:$0x3] }
   0x6   :  { %2416 = vset.pattern.permute.xlu0 %v2755_v9  ;;  %2417 = vset.pattern.permute.xlu1 %v2755_v9  ;;  %v733_v17 = vld [vmem:[%s4857_s4] sm:$0xff]  ;;  %v734_v19 = vld [vmem:[%s4857_s4 + $0x8] sm:$0xff]  ;;  %v735_v20 = vld [vmem:[%s4857_s4 + $0x10] sm:$0xff] }
   0x7   :  { %52 = vperm.xlu0 %2416, %v43_v6   ;;  %62 = vperm.xlu1 %2417, %v45_v8   ;;  %v40_v18 = vld [vmem:[%s4855_s1 + $0x20] sm:$0xff]  ;;  %v41_v21 = vld [vmem:[%s4855_s1 + $0x28] sm:$0xff]  ;;  %v736_v22 = vld [vmem:[%s4857_s4 + $0x18] sm:$0xff] }
   0x8   :  { %2285 = vmatmul.mubr.msk.f32.gmra.mrb[2].mxu0 %vm85_vm1, %v37_v7  ;;  %2294 = vmatmul.mubr.msk.f32.gmra.mrb[2].mxu1 %vm85_vm1, %v37_v7  ;;  %v737_v23 = vld [vmem:[%s4857_s4 + $0x20] sm:$0xff]  ;;  %v42_v24 = vld [vmem:[%s4855_s1 + $0x30] sm:$0x3]  ;;  %v738_v25 = vld [vmem:[%s4857_s4 + $0x28] sm:$0xff] }
   0x9   :  { %196 = vmatprep.mubr.f32.mxu0 %v4864_v3  ;;  %303 = vmatprep.mubr.f32.mxu1 %v4864_v3  ;;  %v739_v26 = vld [vmem:[%s4857_s4 + $0x30] sm:$0x3]  ;;  %v1423_v27 = vld [vmem:[%s4858_s6] sm:$0xff]  ;;  %v1424_v28 = vld [vmem:[%s4858_s6 + $0x8] sm:$0xff] }
   0xa   :  { %v1425_v29 = vld [vmem:[%s4858_s6 + $0x10] sm:$0xff]  ;;  %v1426_v30 = vld [vmem:[%s4858_s6 + $0x18] sm:$0xff]  ;;  %v1427_v31 = vld [vmem:[%s4858_s6 + $0x20] sm:$0xff] }
   0xb   :  { %57 = vperm.xlu0 %2416, %v44_v10   ;;  %67 = vperm.xlu1 %2417, %v46_v11   ;;  %v1428_v32 = vld [vmem:[%s4858_s6 + $0x28] sm:$0xff]  ;;  %v1429_v33 = vld [vmem:[%s4858_s6 + $0x30] sm:$0x3]  ;;  %v2105_v34 = vld [vmem:[%s4859_s8] sm:$0x7] }
   0xc   :  { %2286 = vmatmul.mubr.msk.f32.gmra.mrb[4].mxu0 %vm85_vm1, %v38_v12  ;;  %2295 = vmatmul.mubr.msk.f32.gmra.mrb[4].mxu1 %vm85_vm1, %v38_v12 }
   0xd   :  { %202 = vmatprep.mubr.f32.mxu0 %v4864_v3  ;;  %309 = vmatprep.mubr.f32.mxu1 %v4864_v3 }
   0xf   :  { %72 = vperm.xlu0 %2416, %v47_v13   ;;  %77 = vperm.xlu1 %2417, %v48_v14  }
  0x10   :  { %2287 = vmatmul.mubr.msk.f32.gmra.mrb[6].mxu0 %vm85_vm1, %v39_v15  ;;  %2296 = vmatmul.mubr.msk.f32.gmra.mrb[6].mxu1 %vm85_vm1, %v39_v15 }
  0x11   :  { %208 = vmatprep.mubr.f32.mxu0 %v4864_v3  ;;  %315 = vmatprep.mubr.f32.mxu1 %v4864_v3 }
  0x13   :  { %82 = vperm.xlu0 %2416, %v49_v16   ;;  %742 = vperm.xlu1 %2417, %v733_v17  }
  0x14   :  { %2288 = vmatmul.mubr.msk.f32.gmra.mrb[8].mxu0 %vm85_vm1, %v40_v18  ;;  %2297 = vmatmul.mubr.msk.f32.gmra.mrb[8].mxu1 %vm85_vm1, %v40_v18 }
  0x15   :  { %214 = vmatprep.mubr.f32.mxu0 %v4864_v3  ;;  %321 = vmatprep.mubr.f32.mxu1 %v4864_v3 }
  0x17   :  { %747 = vperm.xlu0 %2416, %v734_v19   ;;  %752 = vperm.xlu1 %2417, %v735_v20  }
  0x18   :  { %2289 = vmatmul.mubr.msk.f32.gmra.mrb[10].mxu0 %vm85_vm1, %v41_v21  ;;  %2298 = vmatmul.mubr.msk.f32.gmra.mrb[10].mxu1 %vm85_vm1, %v41_v21 }
  0x19   :  { %220 = vmatprep.mubr.f32.mxu0 %v4864_v3  ;;  %327 = vmatprep.mubr.f32.mxu1 %v4864_v3 }
  0x1b   :  { %757 = vperm.xlu0 %2416, %v736_v22   ;;  %762 = vperm.xlu1 %2417, %v737_v23  }
  0x1c   :  { %2290 = vmatmul.mubr.msk.f32.gmra.mrb[12].mxu0 %vm85_vm1, %v42_v24  ;;  %2299 = vmatmul.mubr.msk.f32.gmra.mrb[12].mxu1 %vm85_vm1, %v42_v24 }
  0x1d   :  { %874 = vmatprep.mubr.f32.mxu0 %v4864_v3  ;;  %981 = vmatprep.mubr.f32.mxu1 %v4864_v3 }
  0x1f   :  { %767 = vperm.xlu0 %2416, %v738_v25   ;;  %772 = vperm.xlu1 %2417, %v739_v26  }
  0x23   :  { %1432 = vperm.xlu0 %2416, %v1423_v27   ;;  %1437 = vperm.xlu1 %2417, %v1424_v28  }
  0x27   :  { %1442 = vperm.xlu0 %2416, %v1425_v29   ;;  %1447 = vperm.xlu1 %2417, %v1426_v30  }
  0x2b   :  { %1452 = vperm.xlu0 %2416, %v1427_v31   ;;  %1457 = vperm.xlu1 %2417, %v1428_v32  }
  0x2f   :  { %1462 = vperm.xlu0 %2416, %v1429_v33   ;;  %2108 = vperm.xlu1 %2417, %v2105_v34  }
  0x86   :  { %v53_v35 = vpop.permute.xlu0 %52  ;;  %v2947_v54 = vpop.permute.xlu1 %62 }
  0x8a   :  { %v58_v42 = vpop.permute.xlu0 %57  ;;  %v2968_v11 = vpop.permute.xlu1 %67 }
  0xd7   :  { %v186_v36 = vpop.f32.mrb[0].mxu0  ;;  %v293_v37 = vpop.f32.mrb[0].mxu1 }
  0xd8   :  { %v2935_v38 = vadd.f32 %v186_v36, %v53_v35  ;;  %v2937_v39 = vadd.f32 %v293_v37, %v53_v35  ;;  %v188_v40 = vpop.f32.mrb[1].mxu0  ;;  %v295_v41 = vpop.f32.mrb[1].mxu1 }
  0xd9   :  { %v2945_v53 = vadd.f32 %v188_v40, %v53_v35  ;;  %v2952_v63 = vadd.f32 %v295_v41, %v53_v35 }
  0xda   :  { %v362_v43 = vmin.f32 %v2935_v38, 20.0  ;;  %v364_v44 = vmin.f32 %v2937_v39, 20.0  ;;  %vm334_vm2 = vcmp.gt.f32.partialorder %v2935_v38, 20.0  ;;  %vm336_vm4 = vcmp.gt.f32.partialorder %v2937_v39, 20.0 }
  0xdb   :  { %v192_v45 = vpop.f32.mrb[2].mxu0  ;;  %v299_v46 = vpop.f32.mrb[2].mxu1  ;;  %v363_v62 = vmin.f32 %v2945_v53, 20.0  ;;  %v365_v13 = vmin.f32 %v2952_v63, 20.0 }
  0xdc   :  { %v390_v47 = vmul.f32 1.442695, %v362_v43  ;;  %v394_v48 = vmul.f32 1.442695, %v364_v44  ;;  %v2941_v49 = vadd.f32 %v192_v45, %v58_v42  ;;  %v2943_v50 = vadd.f32 %v299_v46, %v58_v42  ;;  %v194_v51 = vpop.f32.mrb[3].mxu0  ;;  %v301_v52 = vpop.f32.mrb[3].mxu1 }
  0xdd   :  { %v2957_v2 = vadd.f32 %v194_v51, %v58_v42  ;;  %v392_v12 = vmul.f32 1.442695, %v363_v62  ;;  %v2972_v16 = vadd.f32 %v301_v52, %v58_v42  ;;  %v396_v26 = vmul.f32 1.442695, %v365_v13 }
  0xde   :  { %2418 = vpow2.f32 %v390_v47  ;;  %v366_v55 = vmin.f32 %v2941_v49, 20.0  ;;  %v368_v56 = vmin.f32 %v2943_v50, 20.0  ;;  %vm338_vm3 = vcmp.gt.f32.partialorder %v2941_v49, 20.0 }
  0xdf   :  { %2420 = vpow2.f32 %v394_v48  ;;  %v198_v57 = vpop.f32.mrb[4].mxu0  ;;  %v305_v58 = vpop.f32.mrb[4].mxu1  ;;  %v367_v15 = vmin.f32 %v2957_v2, 20.0  ;;  %v369_v30 = vmin.f32 %v2972_v16, 20.0  ;;  %vm340_vm5 = vcmp.gt.f32.partialorder %v2943_v50, 20.0 }
  0xe0   :  { %v398_v59 = vmul.f32 1.442695, %v366_v55  ;;  %v200_v60 = vpop.f32.mrb[5].mxu0  ;;  %v307_v61 = vpop.f32.mrb[5].mxu1  ;;  %v402_v0 = vmul.f32 1.442695, %v368_v56  ;;  %v2955_v1 = vadd.f32 %v198_v57, %v2947_v54  ;;  %v2960_v4 = vadd.f32 %v305_v58, %v2947_v54 }
  0xe1   :  { %v400_v29 = vmul.f32 1.442695, %v367_v15  ;;  %v2994_v31 = vadd.f32 %v200_v60, %v2947_v54  ;;  %v404_v44 = vmul.f32 1.442695, %v369_v30  ;;  %v3015_v46 = vadd.f32 %v307_v61, %v2947_v54 }
  0xe2   :  { %2422 = vpow2.f32 %v398_v59  ;;  %v370_v5 = vmin.f32 %v2955_v1, 20.0  ;;  %v372_v8 = vmin.f32 %v2960_v4, 20.0  ;;  %vm342_vm10 = vcmp.gt.f32.partialorder %v2955_v1, 20.0 }
  0xe3   :  { %2424 = vpow2.f32 %v402_v0  ;;  %v204_v6 = vpop.f32.mrb[6].mxu0  ;;  %v311_v7 = vpop.f32.mrb[6].mxu1  ;;  %v371_v45 = vmin.f32 %v2994_v31, 20.0  ;;  %vm344_vm14 = vcmp.gt.f32.partialorder %v2960_v4, 20.0 }
  0xe4   :  { %v2964_v9 = vpop.f32.mrb[7].mxu0  ;;  %v2966_v10 = vpop.f32.mrb[7].mxu1  ;;  %v406_v14 = vmul.f32 1.442695, %v370_v5  ;;  %v410_v17 = vmul.f32 1.442695, %v372_v8  ;;  %v2975_v18 = vadd.f32 %v204_v6, %v2968_v11  ;;  %v2997_v32 = vadd.f32 %v311_v7, %v2968_v11 }
  0xe5   :  { %v3035_v0 = vmul.f32 1.442695, %v371_v45  ;;  %v373_v5 = vmin.f32 %v3015_v46, 20.0  ;;  %v3046_v13 = vadd.f32 %v2964_v9, %v2968_v11 }
  0xe6   :  { %2426 = vpow2.f32 %v406_v14  ;;  %v374_v27 = vmin.f32 %v2975_v18, 20.0  ;;  %v376_v47 = vmin.f32 %v2997_v32, 20.0  ;;  %vm346_vm11 = vcmp.gt.f32.partialorder %v2975_v18, 20.0 }
  0xe7   :  { %v2977_v19 = vpop.f32.mrb[8].mxu0  ;;  %v2979_v20 = vpop.f32.mrb[8].mxu1  ;;  %2428 = vpow2.f32 %v410_v17  ;;  %vm348_vm15 = vcmp.gt.f32.partialorder %v2997_v32, 20.0 }
  0xe8   :  { %v2981_v21 = vpop.eup %2418  ;;  %v2983_v22 = vpop.f32.mrb[9].mxu0  ;;  %2430 = vpow2.f32 %v392_v12  ;;  %v414_v41 = vmul.f32 1.442695, %v374_v27  ;;  %v418_v59 = vmul.f32 1.442695, %v376_v47 }
  0xe9   :  { %v2985_v23 = vpop.f32.mrb[9].mxu1  ;;  %v2987_v24 = vpop.eup %2420  ;;  %v446_v25 = vadd.f32 1.0, %v2981_v21  ;;  %v449_v52 = vmul.f32 -0.5, %v2981_v21  ;;  %v452_v8 = vand.u32 2147483647, %v2981_v21 }
  0xea   :  { %v464_v28 = vadd.f32 1.0, %v2987_v24  ;;  %v467_v58 = vmul.f32 -0.5, %v2987_v24  ;;  %v470_v12 = vand.u32 2147483647, %v2987_v24 }
  0xeb   :  { %2432 = vlog2.f32 %v446_v25  ;;  %v2999_v33 = vpop.f32.mrb[10].mxu0  ;;  %v3003_v35 = vpop.f32.mrb[10].mxu1  ;;  %v450_v7 = vadd.f32 1.0, %v449_v52  ;;  %vm3071_vm6 = vcmp.lt.f32.partialorder %v452_v8, 0.0004427343 }
  0xec   :  { %v3001_v34 = vpop.eup %2422  ;;  %2434 = vlog2.f32 %v464_v28  ;;  %v3005_v36 = vpop.f32.mrb[11].mxu0  ;;  %v468_v15 = vadd.f32 1.0, %v467_v58  ;;  %vm3075_vm7 = vcmp.lt.f32.partialorder %v470_v12, 0.0004427343 }
  0xed   :  { %v3007_v37 = vpop.eup %2424  ;;  %2436 = vpow2.f32 %v396_v26  ;;  %v482_v40 = vadd.f32 1.0, %v3001_v34  ;;  %v3010_v42 = vpop.f32.mrb[11].mxu1  ;;  %v485_v54 = vmul.f32 -0.5, %v3001_v34  ;;  %v488_v25 = vand.u32 2147483647, %v3001_v34 }
  0xee   :  { %v500_v43 = vadd.f32 1.0, %v3007_v37  ;;  %2438 = vpow2.f32 %v400_v29  ;;  %v503_v60 = vmul.f32 -0.5, %v3007_v37  ;;  %v3053_v26 = vadd.f32 %v2966_v10, %v2968_v11  ;;  %v3055_v28 = vpop.permute.xlu0 %72 }
  0xef   :  { %2440 = vlog2.f32 %v482_v40  ;;  %v3018_v48 = vpop.f32.mrb[12].mxu0  ;;  %v3020_v51 = vpop.f32.mrb[12].mxu1  ;;  %v486_v17 = vadd.f32 1.0, %v485_v54  ;;  %v3066_v10 = vadd.f32 %v2979_v20, %v3055_v28  ;;  %v451_v45 = vmul.f32 %v2981_v21, %v450_v7 }
  0xf0   :  { %2442 = vlog2.f32 %v500_v43  ;;  %v3023_v55 = vpop.f32.mrb[13].mxu0  ;;  %v3025_v56 = vpop.f32.mrb[13].mxu1  ;;  %v504_v30 = vadd.f32 1.0, %v503_v60  ;;  %v412_v43 = vmul.f32 1.442695, %v373_v5  ;;  %v469_v54 = vmul.f32 %v2987_v24, %v468_v15 }
  0xf1   :  { %v3027_v57 = vpop.eup %2426  ;;  %2444 = vpow2.f32 %v414_v41  ;;  %v506_v58 = vand.u32 2147483647, %v3007_v37  ;;  %v487_v20 = vmul.f32 %v3001_v34, %v486_v17  ;;  %vm3082_vm8 = vcmp.lt.f32.partialorder %v488_v25, 0.0004427343 }
  0xf2   :  { %2446 = vpow2.f32 %v404_v44  ;;  %v518_v61 = vadd.f32 1.0, %v3027_v57  ;;  %v3033_v62 = vpop.eup %2428  ;;  %v3062_v44 = vadd.f32 %v2977_v19, %v3055_v28  ;;  %v505_v7 = vmul.f32 %v3007_v37, %v504_v30 }
  0xf3   :  { %2448 = vpow2.f32 %v418_v59  ;;  %v3038_v6 = vpop.eup %2430  ;;  %v536_v9 = vadd.f32 1.0, %v3033_v62  ;;  %vm507_vm9 = vcmp.lt.f32.partialorder %v506_v58, 0.0004427343  ;;  %v521_v25 = vmul.f32 -0.5, %v3027_v57 }
  0xf4   :  { %2450 = vlog2.f32 %v518_v61  ;;  %v378_v21 = vmin.f32 %v3062_v44, 20.0  ;;  %v539_v47 = vmul.f32 -0.5, %v3033_v62 }
  0xf5   :  { %v2433_v14 = vpop.eup %2432  ;;  %2452 = vlog2.f32 %v536_v9 }
  0xf6   :  { %v2435_v27 = vpop.eup %2434  ;;  %v448_v29 = vmul.f32 0.6931472, %v2433_v14  ;;  %v422_v12 = vmul.f32 1.442695, %v378_v21  ;;  %v380_v14 = vmin.f32 %v3066_v10, 20.0  ;;  %v78_v21 = vpop.permute.xlu1 %77 }
  0xf7   :  { %v3058_v40 = vpop.eup %2436  ;;  %v466_v41 = vmul.f32 0.6931472, %v2435_v27 }
  0xf8   :  { %v3068_v11 = vpop.eup %2438  ;;  %v454_v61 = vsel %vm3071_vm6, %v451_v45, %v448_v29  ;;  %2454 = vpow2.f32 %v422_v12  ;;  %v426_v58 = vmul.f32 1.442695, %v380_v14  ;;  %v83_v14 = vpop.permute.xlu0 %82 }
  0xf9   :  { %v2441_v19 = vpop.eup %2440  ;;  %v472_v24 = vsel %vm3075_vm7, %v469_v54, %v466_v41  ;;  %v3106_v29 = vsel %vm334_vm2, %v2935_v38, %v454_v61  ;;  %v375_v54 = vmin.f32 %v3046_v13, 20.0  ;;  %v540_v61 = vadd.f32 1.0, %v539_v47 }
  0xfa   :  { %v2443_v60 = vpop.eup %2442  ;;  %v484_v5 = vmul.f32 0.6931472, %v2441_v19  ;;  %v3116_v41 = vsel %vm336_vm4, %v2937_v39, %v472_v24  ;;  %v524_v39 = vand.u32 2147483647, %v3027_v57  ;;  %vm350_vm2 = vcmp.gt.f32.partialorder %v3062_v44, 20.0 }
  0xfb   :  { %v3090_v8 = vpop.eup %2444  ;;  %v502_v34 = vmul.f32 0.6931472, %v2443_v60  ;;  %vm352_vm4 = vcmp.gt.f32.partialorder %v3066_v10, 20.0 }
  0xfc   :  { %v3095_v15 = vpop.eup %2446  ;;  %v490_v17 = vsel %vm3082_vm8, %v487_v20, %v484_v5  ;;  %v554_v37 = vadd.f32 1.0, %v3090_v8  ;;  %v522_v20 = vadd.f32 1.0, %v521_v25  ;;  %v557_v59 = vmul.f32 -0.5, %v3090_v8 }
  0xfd   :  { %v3101_v27 = vpop.eup %2448  ;;  %v3111_v30 = vsel %vm338_vm3, %v2941_v49, %v490_v17  ;;  %v508_v9 = vsel %vm507_vm9, %v505_v7, %v502_v34  ;;  %v377_v5 = vmin.f32 %v3053_v26, 20.0  ;;  %vm3137_vm12 = vcmp.lt.f32.partialorder %v524_v39, 0.0004427343 }
  0xfe   :  { %v3123_v38 = vsel %vm340_vm5, %v2943_v50, %v508_v9  ;;  %2456 = vlog2.f32 %v554_v37  ;;  %v572_v52 = vadd.f32 1.0, %v3101_v27  ;;  %v2451_v19 = vpop.eup %2450  ;;  %v542_v50 = vand.u32 2147483647, %v3033_v62 }
  0xff   :  { %2458 = vpow2.f32 %v3035_v0  ;;  %v520_v60 = vmul.f32 0.6931472, %v2451_v19  ;;  %v2453_v0 = vpop.eup %2452  ;;  %v575_v24 = vmul.f32 -0.5, %v3101_v27  ;;  %v3143_v34 = vadd.f32 %v2999_v33, %v78_v21 }
 0x100   :  { %2460 = vlog2.f32 %v572_v52  ;;  %v523_v12 = vmul.f32 %v3027_v57, %v522_v20  ;;  %vm3149_vm13 = vcmp.lt.f32.partialorder %v542_v50, 0.0004427343  ;;  %v558_v17 = vadd.f32 1.0, %v557_v59 }
 0x101   :  { %2462 = vpow2.f32 %v412_v43  ;;  %v3146_v43 = vadd.f32 %v3003_v35, %v78_v21  ;;  %v416_v25 = vmul.f32 1.442695, %v375_v54  ;;  %v560_v37 = vand.u32 2147483647, %v3090_v8 }
 0x102   :  { %2464 = vpow2.f32 %v426_v58  ;;  %v3158_v33 = vadd.f32 %v2983_v22, %v3055_v28  ;;  %v382_v35 = vmin.f32 %v3143_v34, 20.0  ;;  %v3162_v9 = vpop.eup %2454  ;;  %v526_v47 = vsel %vm3137_vm12, %v523_v12, %v520_v60 }
 0x103   :  { %v384_v57 = vmin.f32 %v3146_v43, 20.0  ;;  %v538_v52 = vmul.f32 0.6931472, %v2453_v0  ;;  %v541_v58 = vmul.f32 %v3033_v62, %v540_v61  ;;  %v420_v19 = vmul.f32 1.442695, %v377_v5 }
 0x104   :  { %v576_v54 = vadd.f32 1.0, %v575_v24  ;;  %v578_v20 = vand.u32 2147483647, %v3101_v27  ;;  %v3170_v22 = vadd.f32 %v2985_v23, %v3055_v28  ;;  %v430_v50 = vmul.f32 1.442695, %v382_v35 }
 0x105   :  { %v559_v3 = vmul.f32 %v3090_v8, %v558_v17  ;;  %v590_v49 = vadd.f32 1.0, %v3162_v9  ;;  %v434_v7 = vmul.f32 1.442695, %v384_v57  ;;  %v3179_v62 = vsel %vm342_vm10, %v2955_v1, %v526_v47 }
 0x106   :  { %vm561_vm0 = vcmp.lt.f32.partialorder %v560_v37, 0.0004427343  ;;  %v379_v61 = vmin.f32 %v3158_v33, 20.0  ;;  %v3183_v23 = vadd.f32 %v3005_v36, %v78_v21  ;;  %v544_v8 = vsel %vm3149_vm13, %v541_v58, %v538_v52 }
 0x107   :  { %2466 = vpow2.f32 %v430_v50  ;;  %v3188_v0 = vadd.f32 %v3010_v42, %v78_v21  ;;  %v577_v36 = vmul.f32 %v3101_v27, %v576_v54  ;;  %vm579_vm1 = vcmp.lt.f32.partialorder %v578_v20, 0.0004427343 }
 0x108   :  { %v2457_v39 = vpop.eup %2456  ;;  %2468 = vpow2.f32 %v434_v7  ;;  %v381_v42 = vmin.f32 %v3170_v22, 20.0  ;;  %v3206_v35 = vadd.f32 %v3018_v48, %v83_v14  ;;  %v3211_v27 = vsel %vm344_vm14, %v2960_v4, %v544_v8 }
 0x109   :  { %v556_v59 = vmul.f32 0.6931472, %v2457_v39  ;;  %v3174_v60 = vpop.eup %2458  ;;  %2470 = vlog2.f32 %v590_v49  ;;  %v424_v49 = vmul.f32 1.442695, %v379_v61  ;;  %v385_v47 = vmin.f32 %v3188_v0, 20.0 }
 0x10a   :  { %v2461_v28 = vpop.eup %2460  ;;  %2472 = vpow2.f32 %v416_v25  ;;  %v593_v48 = vmul.f32 -0.5, %v3162_v9  ;;  %v428_v58 = vmul.f32 1.442695, %v381_v42  ;;  %v386_v4 = vmin.f32 %v3206_v35, 20.0 }
 0x10b   :  { %v562_v5 = vsel %vm561_vm0, %v559_v3, %v556_v59  ;;  %v3190_v24 = vpop.eup %2462  ;;  %v574_v12 = vmul.f32 0.6931472, %v2461_v28  ;;  %2474 = vpow2.f32 %v420_v19  ;;  %v455_v54 = vadd.f32 1.0, %v3038_v6 }
 0x10c   :  { %v3195_v1 = vsel %vm346_vm11, %v2975_v18, %v562_v5  ;;  %v3198_v17 = vpop.eup %2464  ;;  %v383_v18 = vmin.f32 %v3183_v23, 20.0  ;;  %v3225_v20 = vadd.f32 %v3020_v51, %v83_v14  ;;  %v594_v59 = vadd.f32 1.0, %v593_v48 }
 0x10d   :  { %v580_v21 = vsel %vm579_vm1, %v577_v36, %v574_v12  ;;  %v608_v37 = vadd.f32 1.0, %v3198_v17  ;;  %v596_v25 = vand.u32 2147483647, %v3162_v9  ;;  %v611_v7 = vmul.f32 -0.5, %v3198_v17 }
 0x10e   :  { %v3216_v57 = vsel %vm348_vm15, %v2997_v32, %v580_v21  ;;  %v432_v39 = vmul.f32 1.442695, %v383_v18  ;;  %v436_v32 = vmul.f32 1.442695, %v385_v47  ;;  %4893 = vst [vmem:[#allocation2_spill] sm:$0xff] %v3225_v20  ;;  %v388_v51 = vmin.f32 %v3225_v20, 20.0 }
 0x10f   :  { %2476 = vlog2.f32 %v608_v37  ;;  %v438_v28 = vmul.f32 1.442695, %v386_v4  ;;  %v3237_v12 = vadd.f32 %v3023_v55, %v83_v14  ;;  %v3241_v36 = vadd.f32 %v3025_v56, %v83_v14 }
 0x110   :  { %2478 = vpow2.f32 %v424_v49  ;;  %v491_v42 = vadd.f32 1.0, %v3068_v11  ;;  %v595_v21 = vmul.f32 %v3162_v9, %v594_v59  ;;  %vm3245_vm3 = vcmp.lt.f32.partialorder %v596_v25, 0.0004427343 }
 0x111   :  { %2480 = vlog2.f32 %v455_v54  ;;  %v3227_v50 = vpop.eup %2466  ;;  %4894 = vst [vmem:[#allocation3_spill] sm:$0xff] %v3241_v36  ;;  %v614_v18 = vand.u32 2147483647, %v3198_v17  ;;  %v612_v47 = vadd.f32 1.0, %v611_v7  ;;  %v458_v56 = vmul.f32 -0.5, %v3038_v6 }
 0x112   :  { %2482 = vpow2.f32 %v428_v58  ;;  %v3230_v19 = vpop.eup %2468  ;;  %v626_v61 = vadd.f32 1.0, %v3227_v50  ;;  %v629_v48 = vmul.f32 -0.5, %v3227_v50  ;;  %v442_v58 = vmul.f32 1.442695, %v388_v51 }
 0x113   :  { %2484 = vpow2.f32 %v432_v39  ;;  %v2471_v8 = vpop.eup %2470  ;;  %v644_v5 = vadd.f32 1.0, %v3230_v19  ;;  %v387_v9 = vmin.f32 %v3237_v12, 20.0  ;;  %v473_v39 = vadd.f32 1.0, %v3058_v40 }
 0x114   :  { %2486 = vpow2.f32 %v436_v32  ;;  %v3250_v49 = vpop.eup %2472  ;;  %v592_v55 = vmul.f32 0.6931472, %v2471_v8  ;;  %v647_v54 = vmul.f32 -0.5, %v3230_v19  ;;  %v389_v32 = vmin.f32 %v3241_v36, 20.0 }
 0x115   :  { %2488 = vlog2.f32 %v626_v61  ;;  %v3254_v14 = vpop.eup %2474  ;;  %v461_v59 = vand.u32 2147483647, %v3038_v6  ;;  %vm3264_vm5 = vcmp.lt.f32.partialorder %v614_v18, 0.0004427343  ;;  %vm354_vm6 = vcmp.gt.f32.partialorder %v3143_v34, 20.0 }
 0x116   :  { %2490 = vlog2.f32 %v644_v5  ;;  %v632_v61 = vand.u32 2147483647, %v3227_v50  ;;  %v598_v5 = vsel %vm3245_vm3, %v595_v21, %v592_v55  ;;  %v630_v51 = vadd.f32 1.0, %v629_v48 }
 0x117   :  { %2492 = vpow2.f32 %v438_v28  ;;  %v494_v28 = vmul.f32 -0.5, %v3068_v11  ;;  %vm356_vm7 = vcmp.gt.f32.partialorder %v3146_v43, 20.0  ;;  %v459_v18 = vadd.f32 1.0, %v458_v56 }
 0x118   :  { %2494 = vlog2.f32 %v491_v42  ;;  %v650_v42 = vand.u32 2147483647, %v3230_v19  ;;  %vm335_vm8 = vcmp.gt.f32.partialorder %v2945_v53, 20.0  ;;  %v613_v45 = vmul.f32 %v3198_v17, %v612_v47 }
 0x119   :  { %v2477_v4 = vpop.eup %2476  ;;  %2496 = vlog2.f32 %v473_v39  ;;  %v440_v20 = vmul.f32 1.442695, %v387_v9  ;;  %v648_v36 = vadd.f32 1.0, %v647_v54  ;;  %v444_v37 = vmul.f32 1.442695, %v389_v32 }
 0x11a   :  { %v3261_v25 = vpop.eup %2478  ;;  %v610_v3 = vmul.f32 0.6931472, %v2477_v4  ;;  %2498 = vpow2.f32 %v442_v58  ;;  %vm3281_vm9 = vcmp.lt.f32.partialorder %v461_v59, 0.0004427343  ;;  %v509_v55 = vadd.f32 1.0, %v3095_v15 }
 0x11b   :  { %v2481_v8 = vpop.eup %2480  ;;  %vm339_vm10 = vcmp.gt.f32.partialorder %v2957_v2, 20.0  ;;  %v3292_v17 = vsel %vm350_vm2, %v3062_v44, %v598_v5  ;;  %vm3294_vm11 = vcmp.lt.f32.partialorder %v632_v61, 0.0004427343  ;;  %v495_v58 = vadd.f32 1.0, %v494_v28 }
 0x11c   :  { %v3275_v52 = vpop.eup %2482  ;;  %v457_v56 = vmul.f32 0.6931472, %v2481_v8  ;;  %v631_v4 = vmul.f32 %v3227_v50, %v630_v51  ;;  %vm3299_vm12 = vcmp.lt.f32.partialorder %v650_v42, 0.0004427343  ;;  %v460_v32 = vmul.f32 %v3038_v6, %v459_v18 }
 0x11d   :  { %v3279_v39 = vpop.eup %2484  ;;  %2500 = vlog2.f32 %v509_v55  ;;  %v616_v44 = vsel %vm3264_vm5, %v613_v45, %v610_v3  ;;  %v476_v5 = vmul.f32 -0.5, %v3058_v40  ;;  %v649_v28 = vmul.f32 %v3230_v19, %v648_v36 }
 0x11e   :  { %v3286_v48 = vpop.eup %2486  ;;  %2502 = vpow2.f32 %v440_v20  ;;  %v497_v50 = vand.u32 2147483647, %v3068_v11  ;;  %v527_v51 = vadd.f32 1.0, %v3174_v60  ;;  %v463_v7 = vsel %vm3281_vm9, %v460_v32, %v457_v56 }
 0x11f   :  { %v2489_v9 = vpop.eup %2488  ;;  %v496_v45 = vmul.f32 %v3068_v11, %v495_v58  ;;  %v512_v3 = vmul.f32 -0.5, %v3095_v15  ;;  %v3321_v19 = vsel %vm352_vm4, %v3066_v10, %v616_v44  ;;  %vm337_vm13 = vcmp.gt.f32.partialorder %v2952_v63, 20.0 }
 0x120   :  { %v2491_v59 = vpop.eup %2490  ;;  %v628_v61 = vmul.f32 0.6931472, %v2489_v9  ;;  %2504 = vlog2.f32 %v527_v51  ;;  %v477_v47 = vadd.f32 1.0, %v476_v5  ;;  %vm498_vm14 = vcmp.lt.f32.partialorder %v497_v50, 0.0004427343 }
 0x121   :  { %v646_v8 = vmul.f32 0.6931472, %v2491_v59  ;;  %v3310_v42 = vpop.eup %2492  ;;  %v699_v56 = vsel %vm335_vm8, %v2945_v53, %v463_v7  ;;  %v479_v58 = vand.u32 2147483647, %v3058_v40  ;;  %v513_v32 = vadd.f32 1.0, %v512_v3 }
 0x122   :  { %v634_v6 = vsel %vm3294_vm11, %v631_v4, %v628_v61  ;;  %v2495_v20 = vpop.eup %2494  ;;  %v515_v44 = vand.u32 2147483647, %v3095_v15  ;;  %v530_v61 = vmul.f32 -0.5, %v3174_v60  ;;  %v545_v5 = vadd.f32 1.0, %v3190_v24 }
 0x123   :  { %v3326_v36 = vsel %vm354_vm6, %v3143_v34, %v634_v6  ;;  %v652_v18 = vsel %vm3299_vm12, %v649_v28, %v646_v8  ;;  %v2497_v21 = vpop.eup %2496  ;;  %v493_v55 = vmul.f32 0.6931472, %v2495_v20  ;;  %vm341_vm15 = vcmp.gt.f32.partialorder %v2972_v16, 20.0 }
 0x124   :  { %v2352_v11 = vpack.c.bf16 %v3326_v36, %v3292_v17  ;;  %v3336_v10 = vsel %vm356_vm7, %v3146_v43, %v652_v18  ;;  %v3344_v9 = vpop.eup %2498  ;;  %v475_v54 = vmul.f32 0.6931472, %v2497_v21  ;;  %v563_v43 = vadd.f32 1.0, %v3250_v49 }
 0x125   :  { %v2364_v34 = vpack.c.bf16 %v3336_v10, %v3321_v19  ;;  %v499_v4 = vsel %vm498_vm14, %v496_v45, %v493_v55  ;;  %v478_v8 = vmul.f32 %v3058_v40, %v477_v47  ;;  %v662_v50 = vadd.f32 1.0, %v3310_v42  ;;  %v727_v19 = vld [vmem:[%s4860_s3 + $0x8] sm:$0xff]  ;;  %v728_v10 = vld [vmem:[%s4860_s3 + $0x10] sm:$0xff] }
 0x126   :  { %v703_v59 = vsel %vm339_vm10, %v2957_v2, %v499_v4  ;;  %2506 = vlog2.f32 %v563_v43  ;;  %v665_v51 = vmul.f32 -0.5, %v3310_v42  ;;  %vm3357_vm0 = vcmp.lt.f32.partialorder %v479_v58, 0.0004427343 }
 0x127   :  { %v2342_v53 = vpack.c.bf16 %v703_v59, %v699_v56  ;;  %v2501_v28 = vpop.eup %2500  ;;  %2508 = vpow2.f32 %v444_v37  ;;  %v481_v7 = vsel %vm3357_vm0, %v478_v8, %v475_v54  ;;  %v514_v40 = vmul.f32 %v3095_v15, %v513_v32 }
 0x128   :  { %v3361_v6 = vpop.eup %2502  ;;  %v511_v45 = vmul.f32 0.6931472, %v2501_v28  ;;  %2510 = vlog2.f32 %v545_v5  ;;  %vm516_vm1 = vcmp.lt.f32.partialorder %v515_v44, 0.0004427343  ;;  %v4907_v3 = vpack.c.bf16 %v3111_v30, %v3106_v29 }
 0x129   :  { %2343 = vmatprep.subr.bf16.mxu0 %v2342_v53  ;;  %v531_v37 = vadd.f32 1.0, %v530_v61  ;;  %v566_v20 = vmul.f32 -0.5, %v3250_v49  ;;  %v581_v18 = vadd.f32 1.0, %v3254_v14  ;;  %vm343_vm2 = vcmp.gt.f32.partialorder %v2994_v31, 20.0 }
 0x12a   :  { %2345 = vmatpush1.bf16.msra.mxu0 %v4907_v3  ;;  %v680_v21 = vadd.f32 1.0, %v3344_v9  ;;  %v517_v55 = vsel %vm516_vm1, %v514_v40, %v511_v45  ;;  %v533_v47 = vand.u32 2147483647, %v3174_v60  ;;  %v548_v15 = vmul.f32 -0.5, %v3190_v24  ;;  %v2505_v56 = vpop.eup %2504 }
 0x12b   :  { %vm347_vm3 = vcmp.gt.f32.partialorder %v3046_v13, 20.0  ;;  %v701_v29 = vsel %vm337_vm13, %v2952_v63, %v481_v7  ;;  %v705_v30 = vsel %vm341_vm15, %v2972_v16, %v517_v55  ;;  %v569_v58 = vand.u32 2147483647, %v3250_v49 }
 0x12c   :  { %2512 = vlog2.f32 %v581_v18  ;;  %v668_v4 = vand.u32 2147483647, %v3310_v42  ;;  %v2354_v54 = vpack.c.bf16 %v705_v30, %v701_v29  ;;  %v529_v32 = vmul.f32 0.6931472, %v2505_v56 }
 0x12d   :  { %v599_v43 = vadd.f32 1.0, %v3261_v25  ;;  %2514 = vlog2.f32 %v662_v50  ;;  %v532_v59 = vmul.f32 %v3174_v60, %v531_v37  ;;  %v567_v44 = vadd.f32 1.0, %v566_v20 }
 0x12e   :  { %v584_v61 = vmul.f32 -0.5, %v3254_v14  ;;  %2355 = vmatprep.subr.bf16.mxu1 %v2354_v54  ;;  %v549_v63 = vadd.f32 1.0, %v548_v15  ;;  %v551_v5 = vand.u32 2147483647, %v3190_v24  ;;  %v635_v16 = vadd.f32 1.0, %v3279_v39 }
 0x12f   :  { %2516 = vlog2.f32 %v599_v43  ;;  %v3389_v53 = vadd.f32 1.0, %v665_v51  ;;  %v4908_v8 = vpack.c.bf16 %v3123_v38, %v3116_v41  ;;  %vm3394_vm4 = vcmp.lt.f32.partialorder %v533_v47, 0.0004427343 }
 0x130   :  { %2518 = vlog2.f32 %v680_v21  ;;  %vm3398_vm5 = vcmp.lt.f32.partialorder %v569_v58, 0.0004427343  ;;  %v2507_v50 = vpop.eup %2506  ;;  %vm345_vm6 = vcmp.gt.f32.partialorder %v3015_v46, 20.0  ;;  %vm349_vm7 = vcmp.gt.f32.partialorder %v3053_v26, 20.0 }
 0x131   :  { %2357 = vmatpush1.bf16.msra.mxu1 %v4908_v8  ;;  %v535_v51 = vsel %vm3394_vm4, %v532_v59, %v529_v32  ;;  %v602_v2 = vmul.f32 -0.5, %v3261_v25  ;;  %2520 = vlog2.f32 %v635_v16  ;;  %v617_v41 = vadd.f32 1.0, %v3275_v52  ;;  %v3408_v38 = vpop.eup %2508 }
 0x132   :  { %v565_v7 = vmul.f32 0.6931472, %v2507_v50  ;;  %v568_v45 = vmul.f32 %v3250_v49, %v567_v44  ;;  %v585_v40 = vadd.f32 1.0, %v584_v61  ;;  %v587_v3 = vand.u32 2147483647, %v3254_v14  ;;  %v2511_v37 = vpop.eup %2510 }
 0x133   :  { %v550_v20 = vmul.f32 %v3190_v24, %v549_v63  ;;  %vm3413_vm8 = vcmp.lt.f32.partialorder %v551_v5, 0.0004427343  ;;  %2522 = vlog2.f32 %v617_v41  ;;  %v653_v21 = vadd.f32 1.0, %v3286_v48 }
 0x134   :  { %v571_v55 = vsel %vm3398_vm5, %v568_v45, %v565_v7  ;;  %v707_v49 = vsel %vm343_vm2, %v2994_v31, %v535_v51  ;;  %v547_v47 = vmul.f32 0.6931472, %v2511_v37  ;;  %v638_v15 = vmul.f32 -0.5, %v3279_v39 }
 0x135   :  { %v711_v24 = vsel %vm347_vm3, %v3046_v13, %v571_v55  ;;  %v603_v56 = vadd.f32 1.0, %v602_v2  ;;  %v620_v29 = vmul.f32 -0.5, %v3275_v52  ;;  %2524 = vlog2.f32 %v653_v21 }
 0x136   :  { %v2513_v30 = vpop.eup %2512  ;;  %vm351_vm9 = vcmp.gt.f32.partialorder %v3158_v33, 20.0  ;;  %vm355_vm10 = vcmp.gt.f32.partialorder %v3183_v23, 20.0  ;;  %v2346_v58 = vpack.c.bf16 %v711_v24, %v707_v49  ;;  %v586_v54 = vmul.f32 %v3254_v14, %v585_v40 }
 0x137   :  { %vm3431_vm11 = vcmp.lt.f32.partialorder %v587_v3, 0.0004427343  ;;  %v671_v32 = vadd.f32 1.0, %v3361_v6  ;;  %v553_v13 = vsel %vm3413_vm8, %v550_v20, %v547_v47  ;;  %v583_v43 = vmul.f32 0.6931472, %v2513_v30  ;;  %v2515_v61 = vpop.eup %2514 }
 0x138   :  { %v605_v59 = vand.u32 2147483647, %v3261_v25  ;;  %v656_v44 = vmul.f32 -0.5, %v3286_v48  ;;  %2347 = vmatprep.subr.bf16.mxu0 %v2346_v58  ;;  %v639_v63 = vadd.f32 1.0, %v638_v15  ;;  %v641_v5 = vand.u32 2147483647, %v3279_v39 }
 0x139   :  { %2526 = vlog2.f32 %v671_v32  ;;  %v689_v14 = vadd.f32 1.0, %v3408_v38  ;;  %v2517_v16 = vpop.eup %2516  ;;  %v589_v8 = vsel %vm3431_vm11, %v586_v54, %v583_v43  ;;  %v4917_v28 = vpack.c.bf16 %v3195_v1, %v3179_v62 }
 0x13a   :  { %v604_v60 = vmul.f32 %v3261_v25, %v603_v56  ;;  %v621_v50 = vadd.f32 1.0, %v620_v29  ;;  %v623_v51 = vand.u32 2147483647, %v3275_v52  ;;  %v2519_v2 = vpop.eup %2518  ;;  %vm353_vm12 = vcmp.gt.f32.partialorder %v3170_v22, 20.0 }
 0x13b   :  { %2349 = vmatpush1.bf16.msra.mxu0 %v4917_v28  ;;  %vm357_vm13 = vcmp.gt.f32.partialorder %v3188_v0, 20.0  ;;  %v709_v41 = vsel %vm345_vm6, %v3015_v46, %v553_v13  ;;  %v713_v7 = vsel %vm349_vm7, %v3053_v26, %v589_v8  ;;  %v601_v62 = vmul.f32 0.6931472, %v2517_v16  ;;  %v2521_v1 = vpop.eup %2520 }
 0x13c   :  { %2528 = vlog2.f32 %v689_v14  ;;  %vm3459_vm14 = vcmp.lt.f32.partialorder %v668_v4, 0.0004427343  ;;  %v2358_v45 = vpack.c.bf16 %v713_v7, %v709_v41  ;;  %vm3463_vm15 = vcmp.lt.f32.partialorder %v605_v59, 0.0004427343  ;;  %v730_v41 = vld [vmem:[%s4860_s3 + $0x20] sm:$0xff]  ;;  %v731_v7 = vld [vmem:[%s4860_s3 + $0x28] sm:$0xff] }
 0x13d   :  { %v657_v3 = vadd.f32 1.0, %v656_v44  ;;  %v674_v46 = vmul.f32 -0.5, %v3361_v6  ;;  %v664_v37 = vmul.f32 0.6931472, %v2515_v61  ;;  %v607_v26 = vsel %vm3463_vm15, %v604_v60, %v601_v62  ;;  %v2523_v4 = vpop.eup %2522  ;;  %v732_v62 = vld [vmem:[%s4860_s3 + $0x30] sm:$0x3] }
 0x13e   :  { %v637_v20 = vmul.f32 0.6931472, %v2521_v1  ;;  %v640_v18 = vmul.f32 %v3279_v39, %v639_v63  ;;  %vm797_vm0 = vcmask 1041408   ;;  %v683_v21 = vmul.f32 -0.5, %v3344_v9  ;;  %2359 = vmatprep.subr.bf16.mxu1 %v2358_v45  ;;  %v743_v1 = vpop.permute.xlu1 %742 }
 0x13f   :  { %vm642_vm1 = vcmp.lt.f32.partialorder %v641_v5, 0.0004427343  ;;  %v659_v55 = vand.u32 2147483647, %v3286_v48  ;;  %v692_v49 = vmul.f32 -0.5, %v3408_v38  ;;  %v4922_v47 = vpack.c.bf16 %v3216_v57, %v3211_v27  ;;  %v2525_v29 = vpop.eup %2524 }
 0x140   :  { %v643_v15 = vsel %vm642_vm1, %v640_v18, %v637_v20  ;;  %v619_v24 = vmul.f32 0.6931472, %v2523_v4  ;;  %v622_v56 = vmul.f32 %v3275_v52, %v621_v50  ;;  %vm3478_vm2 = vcmp.lt.f32.partialorder %v623_v51, 0.0004427343  ;;  %v4928_v51 = vld [vmem:[#allocation2_spill] sm:$0xff] }
 0x141   :  { %2361 = vmatpush1.bf16.msra.mxu1 %v4922_v47  ;;  %vm775_vm3 = vcmask 408576   ;;  %v715_v30 = vsel %vm351_vm9, %v3158_v33, %v607_v26  ;;  %v719_v58 = vsel %vm355_vm10, %v3183_v23, %v643_v15  ;;  %v658_v27 = vmul.f32 %v3286_v48, %v657_v3  ;;  %v3582_v3 = vpop.permute.xlu0 %747 }
 0x142   :  { %v675_v57 = vadd.f32 1.0, %v674_v46  ;;  %v2350_v54 = vpack.c.bf16 %v719_v58, %v715_v30  ;;  %v625_v52 = vsel %vm3478_vm2, %v622_v56, %v619_v24  ;;  %v655_v31 = vmul.f32 0.6931472, %v2525_v29 }
 0x143   :  { %v677_v32 = vand.u32 2147483647, %v3361_v6  ;;  %v684_v13 = vadd.f32 1.0, %v683_v21  ;;  %v686_v43 = vand.u32 2147483647, %v3344_v9  ;;  %v693_v59 = vadd.f32 1.0, %v692_v49  ;;  %v2527_v33 = vpop.eup %2526 }
 0x144   :  { %vm660_vm4 = vcmp.lt.f32.partialorder %v659_v55, 0.0004427343  ;;  %v667_v44 = vmul.f32 %v3310_v42, %v3389_v53  ;;  %v682_v23 = vmul.f32 0.6931472, %v2519_v2  ;;  %2351 = vmatprep.subr.bf16.mxu0 %v2350_v54  ;;  %v695_v61 = vand.u32 2147483647, %v3408_v38  ;;  %v3598_v54 = vpop.permute.xlu1 %752 }
 0x145   :  { %v661_v48 = vsel %vm660_vm4, %v658_v27, %v655_v31  ;;  %v717_v63 = vsel %vm353_vm12, %v3170_v22, %v625_v52  ;;  %2353 = vmatpush1.bf16.msra.mxu0 %v2352_v11  ;;  %v673_v14 = vmul.f32 0.6931472, %v2527_v33  ;;  %v676_v42 = vmul.f32 %v3361_v6, %v675_v57  ;;  %v726_v11 = vld [vmem:[%s4860_s3] sm:$0xff] }
 0x146   :  { %v721_v5 = vsel %vm357_vm13, %v3188_v0, %v661_v48  ;;  %v2529_v53 = vpop.eup %2528  ;;  %v670_v16 = vsel %vm3459_vm14, %v667_v44, %v664_v37  ;;  %vm359_vm5 = vcmp.gt.f32.partialorder %v3237_v12, 20.0  ;;  %vm678_vm6 = vcmp.lt.f32.partialorder %v677_v32, 0.0004427343  ;;  %v3610_v48 = vpop.permute.xlu0 %757 }
 0x147   :  { %v2362_v8 = vpack.c.bf16 %v721_v5, %v717_v63  ;;  %v685_v22 = vmul.f32 %v3344_v9, %v684_v13  ;;  %v679_v28 = vsel %vm678_vm6, %v676_v42, %v673_v14  ;;  %v691_v60 = vmul.f32 0.6931472, %v2529_v53 }
 0x148   :  { %v694_v0 = vmul.f32 %v3408_v38, %v693_v59  ;;  %vm358_vm7 = vcmp.gt.f32.partialorder %v3206_v35, 20.0  ;;  %vm3512_vm8 = vcmp.lt.f32.partialorder %v686_v43, 0.0004427343  ;;  %v723_v36 = vsel %vm359_vm5, %v3237_v12, %v679_v28  ;;  %v4927_v38 = vld [vmem:[#allocation3_spill] sm:$0xff] }
 0x149   :  { %2363 = vmatprep.subr.bf16.mxu1 %v2362_v8  ;;  %vm696_vm9 = vcmp.lt.f32.partialorder %v695_v61, 0.0004427343  ;;  %v722_v9 = vsel %vm358_vm7, %v3206_v35, %v670_v16  ;;  %v688_v6 = vsel %vm3512_vm8, %v685_v22, %v682_v23  ;;  %vm361_vm10 = vcmp.gt.f32.partialorder %v4927_v38, 20.0  ;;  %2300 = vmatprep.subr.msk.mxu0 %vm797_vm0, %v723_v36 }
 0x14a   :  { %2365 = vmatpush1.bf16.msra.mxu1 %v2364_v34  ;;  %v697_v50 = vsel %vm696_vm9, %v694_v0, %v691_v60  ;;  %2301 = vmatpush1.msk.msra.mxu0 %vm797_vm0, %v722_v9  ;;  %vm360_vm11 = vcmp.gt.f32.partialorder %v4928_v51, 20.0  ;;  %v4929_v2 = vmov 0.0   ;;  %v729_v34 = vld [vmem:[%s4860_s3 + $0x18] sm:$0xff] }
 0x14b   :  { %v725_v12 = vsel %vm361_vm10, %v4927_v38, %v697_v50  ;;  %2302 = vmatmul.mubr.msk.f32.vlgmr.msra.gmra.mrb[14].mxu0 %vm775_vm3, %v726_v11  ;;  %v724_v35 = vsel %vm360_vm11, %v4928_v51, %v688_v6 }
 0x14c   :  { %2309 = vmatprep.subr.msk.mxu1 %vm797_vm0, %v725_v12  ;;  %880 = vmatprep.mubr.f32.mxu0 %v4929_v2 }
 0x14e   :  { %2310 = vmatpush1.msk.msra.mxu1 %vm797_vm0, %v724_v35 }
 0x14f   :  { %2311 = vmatmul.mubr.msk.f32.vlgmr.msra.gmra.mrb[14].mxu1 %vm775_vm3, %v726_v11  ;;  %2303 = vmatmul.mubr.msk.f32.gmra.mrb[16].mxu0 %vm775_vm3, %v727_v19 }
 0x150   :  { %987 = vmatprep.mubr.f32.mxu1 %v4929_v2  ;;  %886 = vmatprep.mubr.f32.mxu0 %v4929_v2 }
 0x153   :  { %2312 = vmatmul.mubr.msk.f32.gmra.mrb[16].mxu1 %vm775_vm3, %v727_v19  ;;  %2304 = vmatmul.mubr.msk.f32.gmra.mrb[18].mxu0 %vm775_vm3, %v728_v10 }
 0x154   :  { %993 = vmatprep.mubr.f32.mxu1 %v4929_v2  ;;  %892 = vmatprep.mubr.f32.mxu0 %v4929_v2 }
 0x157   :  { %2313 = vmatmul.mubr.msk.f32.gmra.mrb[18].mxu1 %vm775_vm3, %v728_v10  ;;  %2305 = vmatmul.mubr.msk.f32.gmra.mrb[20].mxu0 %vm775_vm3, %v729_v34 }
 0x158   :  { %999 = vmatprep.mubr.f32.mxu1 %v4929_v2  ;;  %898 = vmatprep.mubr.f32.mxu0 %v4929_v2 }
 0x15b   :  { %2314 = vmatmul.mubr.msk.f32.gmra.mrb[20].mxu1 %vm775_vm3, %v729_v34  ;;  %2306 = vmatmul.mubr.msk.f32.gmra.mrb[22].mxu0 %vm775_vm3, %v730_v41 }
 0x15c   :  { %1005 = vmatprep.mubr.f32.mxu1 %v4929_v2  ;;  %904 = vmatprep.mubr.f32.mxu0 %v4929_v2 }
 0x15f   :  { %2315 = vmatmul.mubr.msk.f32.gmra.mrb[22].mxu1 %vm775_vm3, %v730_v41  ;;  %2307 = vmatmul.mubr.msk.f32.gmra.mrb[24].mxu0 %vm775_vm3, %v731_v7 }
 0x160   :  { %1011 = vmatprep.mubr.f32.mxu1 %v4929_v2  ;;  %910 = vmatprep.mubr.f32.mxu0 %v4929_v2 }
 0x163   :  { %2316 = vmatmul.mubr.msk.f32.gmra.mrb[24].mxu1 %vm775_vm3, %v731_v7  ;;  %2308 = vmatmul.mubr.msk.f32.gmra.mrb[26].mxu0 %vm775_vm3, %v732_v62 }
 0x164   :  { %1017 = vmatprep.mubr.f32.mxu1 %v4929_v2  ;;  %1562 = vmatprep.mubr.f32.mxu0 %v4929_v2 }
 0x167   :  { %2317 = vmatmul.mubr.msk.f32.gmra.mrb[26].mxu1 %vm775_vm3, %v732_v62 }
 0x168   :  { %1669 = vmatprep.mubr.f32.mxu1 %v4929_v2 }
 0x21e   :  { %v876_v25 = vpop.f32.mrb[14].mxu0 }
 0x21f   :  { %v3580_v45 = vadd.f32 %v876_v25, %v743_v1  ;;  %v878_v40 = vpop.f32.mrb[15].mxu0 }
 0x220   :  { %v3595_v58 = vadd.f32 %v878_v40, %v743_v1 }
 0x221   :  { %v1052_v46 = vmin.f32 %v3580_v45, 20.0  ;;  %vm1024_vm12 = vcmp.gt.f32.partialorder %v3580_v45, 20.0 }
 0x222   :  { %v983_v37 = vpop.f32.mrb[14].mxu1  ;;  %v882_v18 = vpop.f32.mrb[16].mxu0  ;;  %v1053_v44 = vmin.f32 %v3595_v58, 20.0 }
 0x223   :  { %v3585_v26 = vadd.f32 %v983_v37, %v743_v1  ;;  %v985_v20 = vpop.f32.mrb[15].mxu1  ;;  %v1080_v4 = vmul.f32 1.442695, %v1052_v46  ;;  %v3588_v21 = vadd.f32 %v882_v18, %v3582_v3  ;;  %v884_v55 = vpop.f32.mrb[17].mxu0 }
 0x224   :  { %v3613_v5 = vadd.f32 %v985_v20, %v743_v1  ;;  %v3625_v22 = vadd.f32 %v884_v55, %v3582_v3  ;;  %v1082_v17 = vmul.f32 1.442695, %v1053_v44 }
 0x225   :  { %v1054_v49 = vmin.f32 %v3585_v26, 20.0  ;;  %2530 = vpow2.f32 %v1080_v4  ;;  %v1056_v24 = vmin.f32 %v3588_v21, 20.0  ;;  %vm1028_vm13 = vcmp.gt.f32.partialorder %v3588_v21, 20.0 }
 0x226   :  { %v989_v47 = vpop.f32.mrb[16].mxu1  ;;  %v888_v29 = vpop.f32.mrb[18].mxu0  ;;  %v1055_v38 = vmin.f32 %v3613_v5, 20.0  ;;  %v1057_v35 = vmin.f32 %v3625_v22, 20.0  ;;  %vm1026_vm14 = vcmp.gt.f32.partialorder %v3585_v26, 20.0 }
 0x227   :  { %v1084_v15 = vmul.f32 1.442695, %v1054_v49  ;;  %v3593_v56 = vadd.f32 %v989_v47, %v3582_v3  ;;  %v991_v39 = vpop.f32.mrb[17].mxu1  ;;  %v890_v30 = vpop.f32.mrb[19].mxu0  ;;  %v1088_v27 = vmul.f32 1.442695, %v1056_v24  ;;  %v3601_v32 = vadd.f32 %v888_v29, %v3598_v54 }
 0x228   :  { %v3650_v34 = vadd.f32 %v991_v39, %v3582_v3  ;;  %v3655_v1 = vadd.f32 %v890_v30, %v3598_v54  ;;  %v1086_v46 = vmul.f32 1.442695, %v1055_v38  ;;  %v1090_v18 = vmul.f32 1.442695, %v1057_v35 }
 0x229   :  { %2532 = vpow2.f32 %v1084_v15  ;;  %v1058_v57 = vmin.f32 %v3593_v56, 20.0  ;;  %v1060_v23 = vmin.f32 %v3601_v32, 20.0  ;;  %vm1030_vm15 = vcmp.gt.f32.partialorder %v3593_v56, 20.0 }
 0x22a   :  { %v995_v52 = vpop.f32.mrb[18].mxu1  ;;  %2534 = vpow2.f32 %v1088_v27  ;;  %v894_v59 = vpop.f32.mrb[20].mxu0  ;;  %v1059_v49 = vmin.f32 %v3650_v34, 20.0  ;;  %v1061_v24 = vmin.f32 %v3655_v1, 20.0  ;;  %vm1032_vm6 = vcmp.gt.f32.partialorder %v3601_v32, 20.0 }
 0x22b   :  { %v1092_v31 = vmul.f32 1.442695, %v1058_v57  ;;  %v3604_v13 = vadd.f32 %v995_v52, %v3598_v54  ;;  %v997_v43 = vpop.f32.mrb[19].mxu1  ;;  %v3606_v33 = vpop.f32.mrb[21].mxu0  ;;  %v1096_v14 = vmul.f32 1.442695, %v1060_v23  ;;  %v3616_v42 = vadd.f32 %v894_v59, %v3610_v48 }
 0x22c   :  { %v3678_v27 = vadd.f32 %v997_v43, %v3598_v54  ;;  %v3690_v54 = vmul.f32 1.442695, %v1059_v49 }
 0x22d   :  { %2536 = vpow2.f32 %v1092_v31  ;;  %v1062_v61 = vmin.f32 %v3604_v13, 20.0  ;;  %v1064_v11 = vmin.f32 %v3616_v42, 20.0  ;;  %vm1034_vm7 = vcmp.gt.f32.partialorder %v3604_v13, 20.0 }
 0x22e   :  { %v1001_v63 = vpop.f32.mrb[20].mxu1  ;;  %v3620_v16 = vpop.f32.mrb[22].mxu0  ;;  %2538 = vpow2.f32 %v1096_v14  ;;  %vm1036_vm8 = vcmp.gt.f32.partialorder %v3616_v42, 20.0 }
 0x22f   :  { %v3618_v53 = vpop.f32.mrb[21].mxu1  ;;  %v3622_v8 = vpop.eup %2530  ;;  %v1100_v28 = vmul.f32 1.442695, %v1062_v61  ;;  %v3631_v36 = vadd.f32 %v1001_v63, %v3610_v48  ;;  %v1104_v41 = vmul.f32 1.442695, %v1064_v11 }
 0x230   :  { %v3627_v60 = vpop.f32.mrb[23].mxu0  ;;  %v1136_v0 = vadd.f32 1.0, %v3622_v8  ;;  %v1139_v55 = vmul.f32 -0.5, %v3622_v8  ;;  %v1142_v31 = vand.u32 2147483647, %v3622_v8  ;;  %v3698_v11 = vpop.permute.xlu1 %762 }
 0x231   :  { %2540 = vpow2.f32 %v1100_v28  ;;  %v1066_v7 = vmin.f32 %v3631_v36, 20.0 }
 0x232   :  { %v3634_v9 = vpop.f32.mrb[22].mxu1  ;;  %2542 = vlog2.f32 %v1136_v0  ;;  %v3641_v12 = vpop.f32.mrb[24].mxu0  ;;  %v1140_v61 = vadd.f32 1.0, %v1139_v55  ;;  %v3694_v0 = vmul.f32 1.442695, %v1061_v24 }
 0x233   :  { %v3636_v6 = vpop.eup %2532  ;;  %v3639_v50 = vpop.f32.mrb[23].mxu1  ;;  %2544 = vpow2.f32 %v1082_v17  ;;  %v1108_v37 = vmul.f32 1.442695, %v1066_v7  ;;  %vm3704_vm1 = vcmp.lt.f32.partialorder %v1142_v31, 0.0004427343 }
 0x234   :  { %v1154_v51 = vadd.f32 1.0, %v3636_v6  ;;  %v3645_v19 = vpop.f32.mrb[25].mxu0  ;;  %v3647_v10 = vpop.eup %2534  ;;  %v1157_v15 = vmul.f32 -0.5, %v3636_v6  ;;  %v1160_v63 = vand.u32 2147483647, %v3636_v6  ;;  %v1141_v55 = vmul.f32 %v3622_v8, %v1140_v61 }
 0x235   :  { %v1172_v62 = vadd.f32 1.0, %v3647_v10  ;;  %v1175_v30 = vmul.f32 -0.5, %v3647_v10  ;;  %v1178_v28 = vand.u32 2147483647, %v3647_v10 }
 0x236   :  { %2546 = vlog2.f32 %v1154_v51  ;;  %v3657_v25 = vpop.f32.mrb[24].mxu1  ;;  %v3664_v4 = vpop.f32.mrb[26].mxu0  ;;  %v1158_v14 = vadd.f32 1.0, %v1157_v15  ;;  %vm3719_vm2 = vcmp.lt.f32.partialorder %v1160_v63, 0.0004427343 }
 0x237   :  { %v3659_v40 = vpop.eup %2536  ;;  %2548 = vpow2.f32 %v1104_v41  ;;  %v3661_v20 = vpop.f32.mrb[25].mxu1  ;;  %v1176_v51 = vadd.f32 1.0, %v1175_v30  ;;  %v1063_v41 = vmin.f32 %v3678_v27, 20.0  ;;  %vm3724_vm4 = vcmp.lt.f32.partialorder %v1178_v28, 0.0004427343 }
 0x238   :  { %2550 = vlog2.f32 %v1172_v62  ;;  %v1190_v3 = vadd.f32 1.0, %v3659_v40  ;;  %v3668_v47 = vpop.f32.mrb[27].mxu0  ;;  %v3674_v29 = vpop.eup %2538  ;;  %v1193_v59 = vmul.f32 -0.5, %v3659_v40  ;;  %v1196_v35 = vand.u32 2147483647, %v3659_v40 }
 0x239   :  { %2552 = vpow2.f32 %v1108_v37  ;;  %v1208_v44 = vadd.f32 1.0, %v3674_v29  ;;  %v3710_v37 = vadd.f32 %v3606_v33, %v3610_v48  ;;  %v1159_v30 = vmul.f32 %v3636_v6, %v1158_v14 }
 0x23a   :  { %2554 = vlog2.f32 %v1190_v3  ;;  %v3672_v39 = vpop.f32.mrb[26].mxu1  ;;  %v3714_v3 = vadd.f32 %v3620_v16, %v3698_v11  ;;  %v1211_v16 = vmul.f32 -0.5, %v3674_v29  ;;  %vm3735_vm5 = vcmp.lt.f32.partialorder %v1196_v35, 0.0004427343 }
 0x23b   :  { %2556 = vpow2.f32 %v1086_v46  ;;  %v3680_v57 = vpop.f32.mrb[27].mxu1  ;;  %v3682_v52 = vpop.eup %2540  ;;  %v1194_v46 = vadd.f32 1.0, %v1193_v59 }
 0x23c   :  { %2558 = vpow2.f32 %v1090_v18  ;;  %v2543_v23 = vpop.eup %2542  ;;  %v1226_v43 = vadd.f32 1.0, %v3682_v52  ;;  %v1068_v14 = vmin.f32 %v3714_v3, 20.0 }
 0x23d   :  { %2560 = vlog2.f32 %v1208_v44  ;;  %v3696_v17 = vpop.eup %2544  ;;  %v1138_v38 = vmul.f32 0.6931472, %v2543_v23  ;;  %v1177_v23 = vmul.f32 %v3647_v10, %v1176_v51  ;;  %v3750_v51 = vadd.f32 %v3634_v9, %v3698_v11 }
 0x23e   :  { %2562 = vlog2.f32 %v1226_v43  ;;  %v1195_v43 = vmul.f32 %v3659_v40, %v1194_v46  ;;  %v1212_v46 = vadd.f32 1.0, %v1211_v16  ;;  %v1112_v33 = vmul.f32 1.442695, %v1068_v14 }
 0x23f   :  { %v1144_v8 = vsel %vm3704_vm1, %v1141_v55, %v1138_v38  ;;  %v1229_v55 = vmul.f32 -0.5, %v3682_v52 }
 0x240   :  { %v2547_v7 = vpop.eup %2546  ;;  %v3757_v40 = vsel %vm1024_vm12, %v3580_v45, %v1144_v8  ;;  %v1232_v8 = vand.u32 2147483647, %v3682_v52 }
 0x241   :  { %v3716_v18 = vpop.eup %2548  ;;  %v1156_v49 = vmul.f32 0.6931472, %v2547_v7  ;;  %v1230_v61 = vadd.f32 1.0, %v1229_v55 }
 0x242   :  { %v2551_v24 = vpop.eup %2550  ;;  %v1244_v31 = vadd.f32 1.0, %v3716_v18  ;;  %v1247_v15 = vmul.f32 -0.5, %v3716_v18  ;;  %vm3801_vm10 = vcmp.lt.f32.partialorder %v1232_v8, 0.0004427343 }
 0x243   :  { %v3730_v59 = vpop.eup %2552  ;;  %v1174_v44 = vmul.f32 0.6931472, %v2551_v24  ;;  %v1162_v63 = vsel %vm3719_vm2, %v1159_v30, %v1156_v49  ;;  %vm1042_vm2 = vcmp.gt.f32.partialorder %v3750_v51, 20.0 }
 0x244   :  { %v2555_v6 = vpop.eup %2554  ;;  %2564 = vlog2.f32 %v1244_v31  ;;  %v1262_v10 = vadd.f32 1.0, %v3730_v59  ;;  %v3773_v45 = vsel %vm1026_vm14, %v3585_v26, %v1162_v63  ;;  %v1265_v30 = vmul.f32 -0.5, %v3730_v59 }
 0x245   :  { %v3743_v28 = vpop.eup %2556  ;;  %v1180_v38 = vsel %vm3724_vm4, %v1177_v23, %v1174_v44  ;;  %v1192_v7 = vmul.f32 0.6931472, %v2555_v6  ;;  %v1214_v31 = vand.u32 2147483647, %v3674_v29  ;;  %v1070_v26 = vmin.f32 %v3750_v51, 20.0  ;;  %v768_v44 = vpop.permute.xlu0 %767 }
 0x246   :  { %v3752_v35 = vpop.eup %2558  ;;  %v3762_v62 = vsel %vm1028_vm13, %v3588_v21, %v1180_v38  ;;  %2566 = vlog2.f32 %v1262_v10  ;;  %v1102_v6 = vmul.f32 1.442695, %v1063_v41  ;;  %v1248_v63 = vadd.f32 1.0, %v1247_v15 }
 0x247   :  { %v1198_v9 = vsel %vm3735_vm5, %v1195_v43, %v1192_v7  ;;  %v2561_v24 = vpop.eup %2560  ;;  %2568 = vpow2.f32 %v1112_v33  ;;  %v1116_v43 = vmul.f32 1.442695, %v1070_v26  ;;  %v3788_v38 = vadd.f32 %v3641_v12, %v768_v44 }
 0x248   :  { %v3778_v21 = vsel %vm1030_vm15, %v3593_v56, %v1198_v9  ;;  %v1210_v23 = vmul.f32 0.6931472, %v2561_v24  ;;  %v2563_v56 = vpop.eup %2562  ;;  %v3791_v14 = vadd.f32 %v3657_v25, %v768_v44  ;;  %v1213_v7 = vmul.f32 %v3674_v29, %v1212_v46 }
 0x249   :  { %v1250_v10 = vand.u32 2147483647, %v3716_v18  ;;  %v1266_v55 = vadd.f32 1.0, %v1265_v30  ;;  %vm3797_vm9 = vcmp.lt.f32.partialorder %v1214_v31, 0.0004427343  ;;  %v3807_v12 = vadd.f32 %v3618_v53, %v3610_v48 }
 0x24a   :  { %2570 = vpow2.f32 %v1116_v43  ;;  %v1216_v29 = vsel %vm3797_vm9, %v1213_v7, %v1210_v23  ;;  %v1228_v46 = vmul.f32 0.6931472, %v2563_v56  ;;  %v1231_v15 = vmul.f32 %v3682_v52, %v1230_v61 }
 0x24b   :  { %v1072_v24 = vmin.f32 %v3788_v38, 20.0  ;;  %v1249_v33 = vmul.f32 %v3716_v18, %v1248_v63  ;;  %v1268_v31 = vand.u32 2147483647, %v3730_v59  ;;  %v1074_v8 = vmin.f32 %v3791_v14, 20.0 }
 0x24c   :  { %vm1251_vm11 = vcmp.lt.f32.partialorder %v1250_v10, 0.0004427343  ;;  %v1267_v48 = vmul.f32 %v3730_v59, %v1266_v55  ;;  %v3819_v53 = vadd.f32 %v3627_v60, %v3698_v11  ;;  %v3824_v52 = vsel %vm1032_vm6, %v3601_v32, %v1216_v29 }
 0x24d   :  { %v1120_v26 = vmul.f32 1.442695, %v1072_v24  ;;  %v3828_v18 = vadd.f32 %v3639_v50, %v3698_v11  ;;  %v1124_v56 = vmul.f32 1.442695, %v1074_v8  ;;  %v1234_v59 = vsel %vm3801_vm10, %v1231_v15, %v1228_v46  ;;  %v773_v15 = vpop.permute.xlu1 %772 }
 0x24e   :  { %v2565_v25 = vpop.eup %2564  ;;  %vm1269_vm12 = vcmp.lt.f32.partialorder %v1268_v31, 0.0004427343  ;;  %v1065_v43 = vmin.f32 %v3710_v37, 20.0  ;;  %vm1038_vm13 = vcmp.gt.f32.partialorder %v3631_v36, 20.0  ;;  %v1067_v7 = vmin.f32 %v3807_v12, 20.0 }
 0x24f   :  { %v1246_v30 = vmul.f32 0.6931472, %v2565_v25  ;;  %2572 = vpow2.f32 %v1120_v26  ;;  %v1069_v10 = vmin.f32 %v3819_v53, 20.0  ;;  %v3855_v9 = vadd.f32 %v3645_v19, %v768_v44 }
 0x250   :  { %v2567_v23 = vpop.eup %2566  ;;  %2574 = vpow2.f32 %v1124_v56  ;;  %v1071_v29 = vmin.f32 %v3828_v18, 20.0  ;;  %v1110_v24 = vmul.f32 1.442695, %v1067_v7  ;;  %v1145_v56 = vadd.f32 1.0, %v3696_v17 }
 0x251   :  { %v1252_v61 = vsel %vm1251_vm11, %v1249_v33, %v1246_v30  ;;  %v1264_v63 = vmul.f32 0.6931472, %v2567_v23  ;;  %v3840_v50 = vpop.eup %2568  ;;  %2576 = vpow2.f32 %v3690_v54  ;;  %v3869_v54 = vadd.f32 %v3664_v4, %v773_v15 }
 0x252   :  { %v3835_v60 = vsel %vm1036_vm8, %v3616_v42, %v1252_v61  ;;  %v3848_v42 = vsel %vm1034_vm7, %v3604_v13, %v1234_v59  ;;  %v1280_v41 = vadd.f32 1.0, %v3840_v50  ;;  %2578 = vpow2.f32 %v3694_v0 }
 0x253   :  { %v1270_v11 = vsel %vm1269_vm12, %v1267_v48, %v1264_v63  ;;  %v1106_v13 = vmul.f32 1.442695, %v1065_v43  ;;  %2580 = vpow2.f32 %v1102_v6  ;;  %v1114_v30 = vmul.f32 1.442695, %v1069_v10 }
 0x254   :  { %v3851_v55 = vsel %vm1038_vm13, %v3631_v36, %v1270_v11  ;;  %v3861_v46 = vpop.eup %2570  ;;  %v3865_v36 = vadd.f32 %v3661_v20, %v768_v44  ;;  %2582 = vlog2.f32 %v1280_v41  ;;  %v1073_v33 = vmin.f32 %v3855_v9, 20.0 }
 0x255   :  { %v1298_v19 = vadd.f32 1.0, %v3861_v46  ;;  %v1118_v31 = vmul.f32 1.442695, %v1071_v29  ;;  %v1076_v20 = vmin.f32 %v3869_v54, 20.0  ;;  %v3877_v44 = vadd.f32 %v3672_v39, %v773_v15 }
 0x256   :  { %v1075_v0 = vmin.f32 %v3865_v36, 20.0  ;;  %v1283_v4 = vmul.f32 -0.5, %v3840_v50  ;;  %v1122_v26 = vmul.f32 1.442695, %v1073_v33  ;;  %v1301_v23 = vmul.f32 -0.5, %v3861_v46 }
 0x257   :  { %2584 = vlog2.f32 %v1298_v19  ;;  %4942 = vst [vmem:[#allocation3_spill] sm:$0xff] %v3877_v44  ;;  %v1286_v59 = vand.u32 2147483647, %v3840_v50  ;;  %v1128_v43 = vmul.f32 1.442695, %v1076_v20  ;;  %v1078_v11 = vmin.f32 %v3877_v44, 20.0 }
 0x258   :  { %2586 = vpow2.f32 %v1106_v13  ;;  %v1126_v39 = vmul.f32 1.442695, %v1075_v0  ;;  %v3891_v7 = vadd.f32 %v3668_v47, %v773_v15  ;;  %v1284_v41 = vadd.f32 1.0, %v1283_v4 }
 0x259   :  { %v3873_v8 = vpop.eup %2572  ;;  %2588 = vpow2.f32 %v1110_v24  ;;  %v1304_v29 = vand.u32 2147483647, %v3861_v46  ;;  %v1302_v24 = vadd.f32 1.0, %v1301_v23  ;;  %vm3899_vm14 = vcmp.lt.f32.partialorder %v1286_v59, 0.0004427343 }
 0x25a   :  { %v3879_v6 = vpop.eup %2574  ;;  %2590 = vpow2.f32 %v1114_v30  ;;  %v1316_v48 = vadd.f32 1.0, %v3873_v8  ;;  %4943 = vst [vmem:[#allocation2_spill] sm:$0xff] %v3891_v7  ;;  %v1319_v19 = vmul.f32 -0.5, %v3873_v8  ;;  %vm1040_vm15 = vcmp.gt.f32.partialorder %v3714_v3, 20.0 }
 0x25b   :  { %2592 = vpow2.f32 %v1118_v31  ;;  %v1334_v61 = vadd.f32 1.0, %v3879_v6  ;;  %v3887_v63 = vpop.eup %2576  ;;  %v1337_v47 = vmul.f32 -0.5, %v3879_v6  ;;  %v1181_v31 = vadd.f32 1.0, %v3752_v35 }
 0x25c   :  { %2594 = vlog2.f32 %v1316_v48  ;;  %v3893_v10 = vpop.eup %2578  ;;  %vm1044_vm1 = vcmp.gt.f32.partialorder %v3788_v38, 20.0  ;;  %v1322_v20 = vand.u32 2147483647, %v3873_v8  ;;  %v1132_v4 = vmul.f32 1.442695, %v1078_v11 }
 0x25d   :  { %2596 = vlog2.f32 %v1334_v61  ;;  %v3896_v13 = vpop.eup %2580  ;;  %v1077_v48 = vmin.f32 %v3891_v7, 20.0  ;;  %v1285_v23 = vmul.f32 %v3840_v50, %v1284_v41  ;;  %vm3913_vm4 = vcmp.lt.f32.partialorder %v1304_v29, 0.0004427343 }
 0x25e   :  { %2598 = vpow2.f32 %v1122_v26  ;;  %v2583_v30 = vpop.eup %2582  ;;  %vm1046_vm5 = vcmp.gt.f32.partialorder %v3791_v14, 20.0  ;;  %v3920_v59 = vadd.f32 %v3680_v57, %v773_v15  ;;  %v1303_v11 = vmul.f32 %v3861_v46, %v1302_v24 }
 0x25f   :  { %2600 = vlog2.f32 %v1145_v56  ;;  %v1340_v56 = vand.u32 2147483647, %v3879_v6  ;;  %v1320_v25 = vadd.f32 1.0, %v1319_v19  ;;  %v1148_v50 = vmul.f32 -0.5, %v3696_v17 }
 0x260   :  { %2602 = vpow2.f32 %v1126_v39  ;;  %4948 = vst [vmem:[#allocation4_spill] sm:$0xff] %v3920_v59  ;;  %v1338_v32 = vadd.f32 1.0, %v1337_v47  ;;  %v1163_v16 = vadd.f32 1.0, %v3743_v28  ;;  %vm3931_vm6 = vcmp.lt.f32.partialorder %v1322_v20, 0.0004427343 }
 0x261   :  { %v2585_v0 = vpop.eup %2584  ;;  %2604 = vpow2.f32 %v1128_v43  ;;  %v1282_v43 = vmul.f32 0.6931472, %v2583_v30  ;;  %v1130_v15 = vmul.f32 1.442695, %v1077_v48  ;;  %v1151_v46 = vand.u32 2147483647, %v3696_v17 }
 0x262   :  { %v3909_v26 = vpop.eup %2586  ;;  %v1300_v29 = vmul.f32 0.6931472, %v2585_v0  ;;  %2606 = vlog2.f32 %v1181_v31  ;;  %vm3936_vm7 = vcmp.lt.f32.partialorder %v1340_v56, 0.0004427343  ;;  %v1079_v30 = vmin.f32 %v3920_v59, 20.0 }
 0x263   :  { %v3922_v39 = vpop.eup %2588  ;;  %2608 = vpow2.f32 %v1132_v4  ;;  %v1184_v47 = vmul.f32 -0.5, %v3752_v35  ;;  %v1288_v0 = vsel %vm3899_vm14, %v1285_v23, %v1282_v43  ;;  %v1321_v4 = vmul.f32 %v3873_v8, %v1320_v25 }
 0x264   :  { %v3926_v41 = vpop.eup %2590  ;;  %2610 = vlog2.f32 %v1163_v16  ;;  %v1199_v48 = vadd.f32 1.0, %v3887_v63  ;;  %v1306_v56 = vsel %vm3913_vm4, %v1303_v11, %v1300_v29  ;;  %v1339_v59 = vmul.f32 %v3879_v6, %v1338_v32 }
 0x265   :  { %v3929_v49 = vpop.eup %2592  ;;  %v1166_v7 = vmul.f32 -0.5, %v3743_v28  ;;  %vm1025_vm8 = vcmp.gt.f32.partialorder %v3595_v58, 20.0  ;;  %vm1029_vm9 = vcmp.gt.f32.partialorder %v3625_v22, 20.0  ;;  %v1149_v8 = vadd.f32 1.0, %v1148_v50 }
 0x266   :  { %v2595_v24 = vpop.eup %2594  ;;  %v1187_v33 = vand.u32 2147483647, %v3752_v35  ;;  %2612 = vlog2.f32 %v1199_v48  ;;  %v3962_v32 = vsel %vm1040_vm15, %v3714_v3, %v1288_v0  ;;  %v1185_v43 = vadd.f32 1.0, %v1184_v47 }
 0x267   :  { %v2597_v31 = vpop.eup %2596  ;;  %v1318_v20 = vmul.f32 0.6931472, %v2595_v24  ;;  %v3976_v50 = vsel %vm1042_vm2, %v3750_v51, %v1306_v56  ;;  %v1202_v57 = vmul.f32 -0.5, %v3887_v63  ;;  %v1217_v24 = vadd.f32 1.0, %v3893_v10 }
 0x268   :  { %v3946_v2 = vpop.eup %2598  ;;  %v1336_v44 = vmul.f32 0.6931472, %v2597_v31  ;;  %2614 = vpow2.f32 %v1130_v15  ;;  %v1134_v51 = vmul.f32 1.442695, %v1079_v30  ;;  %v1150_v19 = vmul.f32 %v3696_v17, %v1149_v8 }
 0x269   :  { %v2601_v16 = vpop.eup %2600  ;;  %v1324_v25 = vsel %vm3931_vm6, %v1321_v4, %v1318_v20  ;;  %vm3990_vm10 = vcmp.lt.f32.partialorder %v1151_v46, 0.0004427343  ;;  %vm1027_vm11 = vcmp.gt.f32.partialorder %v3613_v5, 20.0  ;;  %v1186_v0 = vmul.f32 %v3752_v35, %v1185_v43 }
 0x26a   :  { %v3957_v23 = vpop.eup %2602  ;;  %v3967_v6 = vsel %vm1044_vm1, %v3788_v38, %v1324_v25  ;;  %v1342_v61 = vsel %vm3936_vm7, %v1339_v59, %v1336_v44  ;;  %v1147_v38 = vmul.f32 0.6931472, %v2601_v16  ;;  %v1167_v59 = vadd.f32 1.0, %v1166_v7 }
 0x26b   :  { %v3971_v11 = vpop.eup %2604  ;;  %v2376_v3 = vpack.c.bf16 %v3967_v6, %v3962_v32  ;;  %v3983_v29 = vsel %vm1046_vm5, %v3791_v14, %v1342_v61  ;;  %2616 = vlog2.f32 %v1217_v24  ;;  %v1253_v7 = vadd.f32 1.0, %v3909_v26 }
 0x26c   :  { %v2388_v44 = vpack.c.bf16 %v3983_v29, %v3976_v50  ;;  %v2607_v31 = vpop.eup %2606  ;;  %v1352_v14 = vadd.f32 1.0, %v3971_v11  ;;  %v1153_v15 = vsel %vm3990_vm10, %v1150_v19, %v1147_v38  ;;  %v1169_v46 = vand.u32 2147483647, %v3743_v28  ;;  %v1417_v29 = vld [vmem:[%s4861_s5 + $0x8] sm:$0xff] }
 0x26d   :  { %v3998_v20 = vpop.eup %2608  ;;  %v1183_v17 = vmul.f32 0.6931472, %v2607_v31  ;;  %v1235_v30 = vadd.f32 1.0, %v3896_v13  ;;  %vm1188_vm12 = vcmp.lt.f32.partialorder %v1187_v33, 0.0004427343  ;;  %v1168_v48 = vmul.f32 %v3743_v28, %v1167_v59 }
 0x26e   :  { %v2611_v4 = vpop.eup %2610  ;;  %v1203_v56 = vadd.f32 1.0, %v1202_v57  ;;  %2618 = vlog2.f32 %v1253_v7  ;;  %v1205_v25 = vand.u32 2147483647, %v3887_v63  ;;  %v1220_v8 = vmul.f32 -0.5, %v3893_v10 }
 0x26f   :  { %v1189_v35 = vsel %vm1188_vm12, %v1186_v0, %v1183_v17  ;;  %v1165_v16 = vmul.f32 0.6931472, %v2611_v4  ;;  %v1389_v61 = vsel %vm1025_vm8, %v3595_v58, %v1153_v15  ;;  %v1256_v33 = vmul.f32 -0.5, %v3909_v26 }
 0x270   :  { %v1393_v43 = vsel %vm1029_vm9, %v3625_v22, %v1189_v35  ;;  %2620 = vlog2.f32 %v1235_v30  ;;  %v2613_v28 = vpop.eup %2612  ;;  %vm1031_vm13 = vcmp.gt.f32.partialorder %v3650_v34, 20.0  ;;  %vm4015_vm14 = vcmp.lt.f32.partialorder %v1169_v46, 0.0004427343 }
 0x271   :  { %2622 = vpow2.f32 %v1134_v51  ;;  %v2366_v38 = vpack.c.bf16 %v1393_v43, %v1389_v61  ;;  %v1171_v58 = vsel %vm4015_vm14, %v1168_v48, %v1165_v16  ;;  %v1201_v57 = vmul.f32 0.6931472, %v2613_v28 }
 0x272   :  { %2624 = vlog2.f32 %v1352_v14  ;;  %v1204_v24 = vmul.f32 %v3887_v63, %v1203_v56  ;;  %vm1033_vm15 = vcmp.gt.f32.partialorder %v3655_v1, 20.0  ;;  %vm1037_vm1 = vcmp.gt.f32.partialorder %v3710_v37, 20.0  ;;  %v4031_v7 = vpop.eup %2614 }
 0x273   :  { %2367 = vmatprep.subr.bf16.mxu0 %v2366_v38  ;;  %vm1206_vm2 = vcmp.lt.f32.partialorder %v1205_v25, 0.0004427343  ;;  %v1221_v22 = vadd.f32 1.0, %v1220_v8  ;;  %v1223_v51 = vand.u32 2147483647, %v3893_v10  ;;  %v1271_v19 = vadd.f32 1.0, %v3922_v39 }
 0x274   :  { %v1207_v47 = vsel %vm1206_vm2, %v1204_v24, %v1201_v57  ;;  %v4957_v31 = vpack.c.bf16 %v3762_v62, %v3757_v40  ;;  %v1257_v14 = vadd.f32 1.0, %v1256_v33  ;;  %v1259_v0 = vand.u32 2147483647, %v3909_v26 }
 0x275   :  { %v1289_v63 = vadd.f32 1.0, %v3926_v41  ;;  %v4034_v15 = vmul.f32 -0.5, %v3971_v11  ;;  %v1391_v17 = vsel %vm1027_vm11, %v3613_v5, %v1171_v58  ;;  %v1395_v46 = vsel %vm1031_vm13, %v3650_v34, %v1207_v47  ;;  %v2617_v40 = vpop.eup %2616 }
 0x276   :  { %2369 = vmatpush1.bf16.msra.mxu0 %v4957_v31  ;;  %2626 = vlog2.f32 %v1271_v19  ;;  %v1370_v62 = vadd.f32 1.0, %v3998_v20  ;;  %v2378_v30 = vpack.c.bf16 %v1395_v46, %v1391_v17  ;;  %v1238_v4 = vmul.f32 -0.5, %v3896_v13 }
 0x277   :  { %2628 = vlog2.f32 %v1289_v63  ;;  %v1219_v48 = vmul.f32 0.6931472, %v2617_v40  ;;  %v1222_v56 = vmul.f32 %v3893_v10, %v1221_v22  ;;  %v1274_v35 = vmul.f32 -0.5, %v3922_v39 }
 0x278   :  { %v1325_v16 = vadd.f32 1.0, %v3946_v2  ;;  %v2619_v5 = vpop.eup %2618  ;;  %2379 = vmatprep.subr.bf16.mxu1 %v2378_v30  ;;  %vm4047_vm4 = vcmp.lt.f32.partialorder %v1223_v51, 0.0004427343  ;;  %v1258_v34 = vmul.f32 %v3909_v26, %v1257_v14  ;;  %vm4052_vm5 = vcmp.lt.f32.partialorder %v1259_v0, 0.0004427343 }
 0x279   :  { %v1307_v61 = vadd.f32 1.0, %v3929_v49  ;;  %v4962_v10 = vpack.c.bf16 %v3778_v21, %v3773_v45  ;;  %v1225_v43 = vsel %vm4047_vm4, %v1222_v56, %v1219_v48  ;;  %v1255_v33 = vmul.f32 0.6931472, %v2619_v5 }
 0x27a   :  { %v1292_v28 = vmul.f32 -0.5, %v3926_v41  ;;  %2630 = vlog2.f32 %v1325_v16  ;;  %v2621_v38 = vpop.eup %2620  ;;  %vm1035_vm6 = vcmp.gt.f32.partialorder %v3678_v27, 20.0  ;;  %vm1039_vm7 = vcmp.gt.f32.partialorder %v3807_v12, 20.0 }
 0x27b   :  { %2381 = vmatpush1.bf16.msra.mxu1 %v4962_v10  ;;  %v1239_v26 = vadd.f32 1.0, %v1238_v4  ;;  %v1241_v59 = vand.u32 2147483647, %v3896_v13  ;;  %v1277_v58 = vand.u32 2147483647, %v3922_v39  ;;  %v1328_v45 = vmul.f32 -0.5, %v3946_v2  ;;  %v4068_v21 = vpop.eup %2622 }
 0x27c   :  { %v1261_v57 = vsel %vm4052_vm5, %v1258_v34, %v1255_v33  ;;  %v1275_v24 = vadd.f32 1.0, %v1274_v35  ;;  %v1295_v22 = vand.u32 2147483647, %v3926_v41  ;;  %2632 = vlog2.f32 %v1307_v61  ;;  %v2625_v51 = vpop.eup %2624 }
 0x27d   :  { %v1397_v19 = vsel %vm1033_vm15, %v3655_v1, %v1225_v43  ;;  %v1401_v47 = vsel %vm1037_vm1, %v3710_v37, %v1261_v57  ;;  %v1237_v31 = vmul.f32 0.6931472, %v2621_v38  ;;  %v1343_v14 = vadd.f32 1.0, %v3957_v23 }
 0x27e   :  { %v1358_v0 = vand.u32 2147483647, %v3971_v11  ;;  %2634 = vlog2.f32 %v1370_v62  ;;  %v2370_v63 = vpack.c.bf16 %v1401_v47, %v1397_v19  ;;  %v1293_v17 = vadd.f32 1.0, %v1292_v28 }
 0x27f   :  { %vm1041_vm8 = vcmp.gt.f32.partialorder %v3819_v53, 20.0  ;;  %vm1045_vm9 = vcmp.gt.f32.partialorder %v3855_v9, 20.0  ;;  %v1240_v46 = vmul.f32 %v3896_v13, %v1239_v26  ;;  %v1329_v40 = vadd.f32 1.0, %v1328_v45 }
 0x280   :  { %v1310_v1 = vmul.f32 -0.5, %v3929_v49  ;;  %2636 = vlog2.f32 %v1343_v14  ;;  %v2627_v30 = vpop.eup %2626  ;;  %2371 = vmatprep.subr.bf16.mxu0 %v2370_v63  ;;  %vm4085_vm10 = vcmp.lt.f32.partialorder %v1241_v59, 0.0004427343  ;;  %v1276_v62 = vmul.f32 %v3922_v39, %v1275_v24 }
 0x281   :  { %vm4090_vm11 = vcmp.lt.f32.partialorder %v1277_v58, 0.0004427343  ;;  %v1361_v48 = vadd.f32 1.0, %v4031_v7  ;;  %v2629_v56 = vpop.eup %2628  ;;  %v1243_v13 = vsel %vm4085_vm10, %v1240_v46, %v1237_v31  ;;  %v1273_v35 = vmul.f32 0.6931472, %v2627_v30 }
 0x282   :  { %v4967_v16 = vpack.c.bf16 %v3835_v60, %v3824_v52  ;;  %vm4100_vm12 = vcmp.lt.f32.partialorder %v1295_v22, 0.0004427343  ;;  %v1331_v39 = vand.u32 2147483647, %v3946_v2  ;;  %v1291_v25 = vmul.f32 0.6931472, %v2629_v56 }
 0x283   :  { %v1294_v34 = vmul.f32 %v3926_v41, %v1293_v17  ;;  %v1346_v8 = vmul.f32 -0.5, %v3957_v23  ;;  %2638 = vlog2.f32 %v1361_v48  ;;  %v1279_v61 = vsel %vm4090_vm11, %v1276_v62, %v1273_v35 }
 0x284   :  { %2373 = vmatpush1.bf16.msra.mxu0 %v4967_v16  ;;  %v1330_v10 = vmul.f32 %v3946_v2, %v1329_v40  ;;  %v1311_v43 = vadd.f32 1.0, %v1310_v1  ;;  %v1379_v52 = vadd.f32 1.0, %v4068_v21  ;;  %v2631_v60 = vpop.eup %2630  ;;  %vm1043_vm13 = vcmp.gt.f32.partialorder %v3828_v18, 20.0 }
 0x285   :  { %vm1047_vm14 = vcmp.gt.f32.partialorder %v3865_v36, 20.0  ;;  %v1399_v41 = vsel %vm1035_vm6, %v3678_v27, %v1243_v13  ;;  %v1403_v33 = vsel %vm1039_vm7, %v3807_v12, %v1279_v61  ;;  %v1313_v28 = vand.u32 2147483647, %v3929_v49 }
 0x286   :  { %v1364_v2 = vmul.f32 -0.5, %v4031_v7  ;;  %v2382_v38 = vpack.c.bf16 %v1403_v33, %v1399_v41  ;;  %v1297_v26 = vsel %vm4100_vm12, %v1294_v34, %v1291_v25  ;;  %v1327_v59 = vmul.f32 0.6931472, %v2631_v60  ;;  %v2633_v58 = vpop.eup %2632  ;;  %v1419_v60 = vld [vmem:[%s4861_s5 + $0x18] sm:$0xff]  ;;  %v1420_v41 = vld [vmem:[%s4861_s5 + $0x20] sm:$0xff]  ;;  %v1421_v33 = vld [vmem:[%s4861_s5 + $0x28] sm:$0xff] }
 0x287   :  { %2640 = vlog2.f32 %v1379_v52  ;;  %v1356_v45 = vadd.f32 1.0, %v4034_v15  ;;  %v1373_v57 = vmul.f32 -0.5, %v3998_v20  ;;  %vm1332_vm15 = vcmp.lt.f32.partialorder %v1331_v39, 0.0004427343 }
 0x288   :  { %v1347_v27 = vadd.f32 1.0, %v1346_v8  ;;  %2383 = vmatprep.subr.bf16.mxu1 %v2382_v38  ;;  %v1333_v24 = vsel %vm1332_vm15, %v1330_v10, %v1327_v59  ;;  %v1309_v12 = vmul.f32 0.6931472, %v2633_v58  ;;  %v1312_v22 = vmul.f32 %v3929_v49, %v1311_v43  ;;  %v2635_v47 = vpop.eup %2634  ;;  %v1416_v8 = vld [vmem:[%s4861_s5] sm:$0xff]  ;;  %v4978_v10 = vld [vmem:[#allocation4_spill] sm:$0xff]  ;;  %v4238_v58 = vpop.permute.xlu1 %1437 }
 0x289   :  { %v1349_v19 = vand.u32 2147483647, %v3957_v23  ;;  %v4970_v31 = vpack.c.bf16 %v3851_v55, %v3848_v42  ;;  %v1405_v15 = vsel %vm1041_vm8, %v3819_v53, %v1297_v26  ;;  %v1409_v14 = vsel %vm1045_vm9, %v3855_v9, %v1333_v24 }
 0x28a   :  { %v1365_v63 = vadd.f32 1.0, %v1364_v2  ;;  %v1382_v17 = vmul.f32 -0.5, %v4068_v21  ;;  %v2637_v46 = vpop.eup %2636  ;;  %v1354_v49 = vmul.f32 0.6931472, %v2625_v51  ;;  %vm4137_vm1 = vcmp.lt.f32.partialorder %v1358_v0, 0.0004427343  ;;  %v1433_v2 = vpop.permute.xlu0 %1432 }
 0x28b   :  { %2385 = vmatpush1.bf16.msra.mxu1 %v4970_v31  ;;  %v2374_v1 = vpack.c.bf16 %v1409_v14, %v1405_v15  ;;  %vm4141_vm2 = vcmp.lt.f32.partialorder %v1313_v28, 0.0004427343  ;;  %v1345_v55 = vmul.f32 0.6931472, %v2637_v46  ;;  %v1348_v9 = vmul.f32 %v3957_v23, %v1347_v27  ;;  %v1422_v28 = vld [vmem:[%s4861_s5 + $0x30] sm:$0x3] }
 0x28c   :  { %v1315_v53 = vsel %vm4141_vm2, %v1312_v22, %v1309_v12  ;;  %v1367_v30 = vand.u32 2147483647, %v4031_v7  ;;  %v1357_v37 = vmul.f32 %v3971_v11, %v1356_v45  ;;  %v1374_v51 = vadd.f32 1.0, %v1373_v57 }
 0x28d   :  { %v1376_v0 = vand.u32 2147483647, %v3998_v20  ;;  %2375 = vmatprep.subr.bf16.mxu0 %v2374_v1  ;;  %vm1350_vm4 = vcmp.lt.f32.partialorder %v1349_v19, 0.0004427343  ;;  %v2639_v62 = vpop.eup %2638  ;;  %v1372_v4 = vmul.f32 0.6931472, %v2635_v47  ;;  %v1366_v56 = vmul.f32 %v4031_v7, %v1365_v63 }
 0x28e   :  { %v1351_v48 = vsel %vm1350_vm4, %v1348_v9, %v1345_v55  ;;  %2377 = vmatpush1.bf16.msra.mxu0 %v2376_v3  ;;  %v1383_v13 = vadd.f32 1.0, %v1382_v17  ;;  %v1407_v23 = vsel %vm1043_vm13, %v3828_v18, %v1315_v53  ;;  %v1363_v35 = vmul.f32 0.6931472, %v2639_v62  ;;  %v4975_v3 = vld [vmem:[#allocation2_spill] sm:$0xff]  ;;  %v4254_v55 = vpop.permute.xlu0 %1442 }
 0x28f   :  { %v1411_v11 = vsel %vm1047_vm14, %v3865_v36, %v1351_v48  ;;  %v1385_v16 = vand.u32 2147483647, %v4068_v21  ;;  %v1360_v5 = vsel %vm4137_vm1, %v1357_v37, %v1354_v49  ;;  %vm1368_vm5 = vcmp.lt.f32.partialorder %v1367_v30, 0.0004427343 }
 0x290   :  { %v2386_v39 = vpack.c.bf16 %v1411_v11, %v1407_v23  ;;  %vm1048_vm6 = vcmp.gt.f32.partialorder %v3869_v54, 20.0  ;;  %v1375_v6 = vmul.f32 %v3998_v20, %v1374_v51  ;;  %vm1049_vm7 = vcmp.gt.f32.partialorder %v4975_v3, 20.0 }
 0x291   :  { %v2641_v32 = vpop.eup %2640  ;;  %v1369_v18 = vsel %vm1368_vm5, %v1366_v56, %v1363_v35  ;;  %vm4167_vm8 = vcmp.lt.f32.partialorder %v1376_v0, 0.0004427343  ;;  %v1384_v34 = vmul.f32 %v4068_v21, %v1383_v13  ;;  %v1412_v61 = vsel %vm1048_vm6, %v3869_v54, %v1360_v5  ;;  %v4979_v21 = vld [vmem:[#allocation3_spill] sm:$0xff]  ;;  %v4266_v13 = vpop.permute.xlu1 %1447 }
 0x292   :  { %2387 = vmatprep.subr.bf16.mxu1 %v2386_v39  ;;  %v1413_v36 = vsel %vm1049_vm7, %v4975_v3, %v1369_v18  ;;  %v1381_v25 = vmul.f32 0.6931472, %v2641_v32  ;;  %v1378_v20 = vsel %vm4167_vm8, %v1375_v6, %v1372_v4  ;;  %vm1386_vm9 = vcmp.lt.f32.partialorder %v1385_v16, 0.0004427343 }
 0x293   :  { %2389 = vmatpush1.bf16.msra.mxu1 %v2388_v44  ;;  %2318 = vmatprep.subr.msk.mxu0 %vm797_vm0, %v1413_v36  ;;  %vm1051_vm10 = vcmp.gt.f32.partialorder %v4978_v10, 20.0  ;;  %vm1050_vm11 = vcmp.gt.f32.partialorder %v4979_v21, 20.0  ;;  %v4980_v50 = vmov 0.0   ;;  %v1418_v44 = vld [vmem:[%s4861_s5 + $0x10] sm:$0xff] }
 0x294   :  { %v1387_v43 = vsel %vm1386_vm9, %v1384_v34, %v1381_v25  ;;  %2319 = vmatpush1.msk.msra.mxu0 %vm797_vm0, %v1412_v61  ;;  %v1414_v54 = vsel %vm1050_vm11, %v4979_v21, %v1378_v20 }
 0x295   :  { %v1415_v52 = vsel %vm1051_vm10, %v4978_v10, %v1387_v43  ;;  %2320 = vmatmul.mubr.msk.f32.vlgmr.msra.gmra.mrb[28].mxu0 %vm775_vm3, %v1416_v8 }
 0x296   :  { %2327 = vmatprep.subr.msk.mxu1 %vm797_vm0, %v1415_v52  ;;  %1568 = vmatprep.mubr.f32.mxu0 %v4980_v50 }
 0x297   :  { %2328 = vmatpush1.msk.msra.mxu1 %vm797_vm0, %v1414_v54 }
 0x298   :  { %2329 = vmatmul.mubr.msk.f32.vlgmr.msra.gmra.mrb[28].mxu1 %vm775_vm3, %v1416_v8 }
 0x299   :  { %1675 = vmatprep.mubr.f32.mxu1 %v4980_v50  ;;  %2321 = vmatmul.mubr.msk.f32.gmra.mrb[30].mxu0 %vm775_vm3, %v1417_v29 }
 0x29a   :  { %1574 = vmatprep.mubr.f32.mxu0 %v4980_v50 }
 0x29c   :  { %2330 = vmatmul.mubr.msk.f32.gmra.mrb[30].mxu1 %vm775_vm3, %v1417_v29 }
 0x29d   :  { %1681 = vmatprep.mubr.f32.mxu1 %v4980_v50  ;;  %2322 = vmatmul.mubr.msk.f32.gmra.mrb[32].mxu0 %vm775_vm3, %v1418_v44 }
 0x29e   :  { %1580 = vmatprep.mubr.f32.mxu0 %v4980_v50 }
 0x2a0   :  { %2331 = vmatmul.mubr.msk.f32.gmra.mrb[32].mxu1 %vm775_vm3, %v1418_v44 }
 0x2a1   :  { %1687 = vmatprep.mubr.f32.mxu1 %v4980_v50  ;;  %2323 = vmatmul.mubr.msk.f32.gmra.mrb[34].mxu0 %vm775_vm3, %v1419_v60 }
 0x2a2   :  { %1586 = vmatprep.mubr.f32.mxu0 %v4980_v50 }
 0x2a4   :  { %2332 = vmatmul.mubr.msk.f32.gmra.mrb[34].mxu1 %vm775_vm3, %v1419_v60 }
 0x2a5   :  { %1693 = vmatprep.mubr.f32.mxu1 %v4980_v50  ;;  %2324 = vmatmul.mubr.msk.f32.gmra.mrb[36].mxu0 %vm775_vm3, %v1420_v41 }
 0x2a6   :  { %1592 = vmatprep.mubr.f32.mxu0 %v4980_v50 }
 0x2a8   :  { %2333 = vmatmul.mubr.msk.f32.gmra.mrb[36].mxu1 %vm775_vm3, %v1420_v41 }
 0x2a9   :  { %1699 = vmatprep.mubr.f32.mxu1 %v4980_v50  ;;  %2325 = vmatmul.mubr.msk.f32.gmra.mrb[38].mxu0 %vm775_vm3, %v1421_v33 }
 0x2aa   :  { %1598 = vmatprep.mubr.f32.mxu0 %v4980_v50 }
 0x2ac   :  { %2334 = vmatmul.mubr.msk.f32.gmra.mrb[38].mxu1 %vm775_vm3, %v1421_v33 }
 0x2ad   :  { %1705 = vmatprep.mubr.f32.mxu1 %v4980_v50  ;;  %2326 = vmatmul.mubr.msk.f32.gmra.mrb[40].mxu0 %vm775_vm3, %v1422_v28 }
 0x2ae   :  { %2190 = vmatprep.mubr.f32.mxu0 %v4980_v50 }
 0x2b0   :  { %2335 = vmatmul.mubr.msk.f32.gmra.mrb[40].mxu1 %vm775_vm3, %v1422_v28 }
 0x2b1   :  { %2261 = vmatprep.mubr.f32.mxu1 %v4980_v50 }
 0x368   :  { %v1564_v38 = vpop.f32.mrb[28].mxu0 }
 0x369   :  { %v4236_v26 = vadd.f32 %v1564_v38, %v1433_v2  ;;  %v1566_v59 = vpop.f32.mrb[29].mxu0 }
 0x36a   :  { %v4251_v1 = vadd.f32 %v1566_v59, %v1433_v2 }
 0x36b   :  { %v1740_v45 = vmin.f32 %v4236_v26, 20.0  ;;  %v1671_v57 = vpop.f32.mrb[28].mxu1  ;;  %vm1712_vm12 = vcmp.gt.f32.partialorder %v4236_v26, 20.0 }
 0x36c   :  { %v4241_v27 = vadd.f32 %v1671_v57, %v1433_v2  ;;  %v1673_v24 = vpop.f32.mrb[29].mxu1  ;;  %v1570_v12 = vpop.f32.mrb[30].mxu0  ;;  %v1741_v48 = vmin.f32 %v4251_v1, 20.0 }
 0x36d   :  { %v1768_v22 = vmul.f32 1.442695, %v1740_v45  ;;  %v4244_v19 = vadd.f32 %v1570_v12, %v4238_v58  ;;  %v1572_v47 = vpop.f32.mrb[31].mxu0  ;;  %v4269_v35 = vadd.f32 %v1673_v24, %v1433_v2 }
 0x36e   :  { %v1742_v31 = vmin.f32 %v4241_v27, 20.0  ;;  %v4281_v3 = vadd.f32 %v1572_v47, %v4238_v58  ;;  %v1770_v25 = vmul.f32 1.442695, %v1741_v48  ;;  %vm1714_vm14 = vcmp.gt.f32.partialorder %v4241_v27, 20.0 }
 0x36f   :  { %2642 = vpow2.f32 %v1768_v22  ;;  %v1677_v15 = vpop.f32.mrb[30].mxu1  ;;  %v1744_v63 = vmin.f32 %v4244_v19, 20.0  ;;  %v1743_v10 = vmin.f32 %v4269_v35, 20.0  ;;  %vm1716_vm13 = vcmp.gt.f32.partialorder %v4244_v19, 20.0 }
 0x370   :  { %v1772_v14 = vmul.f32 1.442695, %v1742_v31  ;;  %v4249_v17 = vadd.f32 %v1677_v15, %v4238_v58  ;;  %v1679_v46 = vpop.f32.mrb[31].mxu1  ;;  %v1576_v49 = vpop.f32.mrb[32].mxu0  ;;  %v1745_v54 = vmin.f32 %v4281_v3, 20.0 }
 0x371   :  { %v1578_v40 = vpop.f32.mrb[33].mxu0  ;;  %v1776_v42 = vmul.f32 1.442695, %v1744_v63  ;;  %v4257_v37 = vadd.f32 %v1576_v49, %v4254_v55  ;;  %v4306_v44 = vadd.f32 %v1679_v46, %v4238_v58  ;;  %v1774_v59 = vmul.f32 1.442695, %v1743_v10 }
 0x372   :  { %2644 = vpow2.f32 %v1772_v14  ;;  %v1746_v53 = vmin.f32 %v4249_v17, 20.0  ;;  %v4311_v28 = vadd.f32 %v1578_v40, %v4254_v55  ;;  %v1778_v24 = vmul.f32 1.442695, %v1745_v54 }
 0x373   :  { %v1683_v9 = vpop.f32.mrb[32].mxu1  ;;  %2646 = vpow2.f32 %v1776_v42  ;;  %v1748_v56 = vmin.f32 %v4257_v37, 20.0  ;;  %v1747_v47 = vmin.f32 %v4306_v44, 20.0  ;;  %vm1718_vm15 = vcmp.gt.f32.partialorder %v4249_v17, 20.0 }
 0x374   :  { %v1780_v30 = vmul.f32 1.442695, %v1746_v53  ;;  %v4260_v51 = vadd.f32 %v1683_v9, %v4254_v55  ;;  %v1685_v0 = vpop.f32.mrb[33].mxu1  ;;  %v1582_v62 = vpop.f32.mrb[34].mxu0  ;;  %v1749_v14 = vmin.f32 %v4311_v28, 20.0  ;;  %vm1720_vm6 = vcmp.gt.f32.partialorder %v4257_v37, 20.0 }
 0x375   :  { %v4262_v4 = vpop.f32.mrb[35].mxu0  ;;  %v1784_v16 = vmul.f32 1.442695, %v1748_v56  ;;  %v4272_v5 = vadd.f32 %v1582_v62, %v4266_v13  ;;  %v4334_v40 = vadd.f32 %v1685_v0, %v4254_v55  ;;  %v4346_v55 = vmul.f32 1.442695, %v1747_v47 }
 0x376   :  { %2648 = vpow2.f32 %v1780_v30  ;;  %v1750_v23 = vmin.f32 %v4260_v51, 20.0  ;;  %vm1722_vm7 = vcmp.gt.f32.partialorder %v4260_v51, 20.0 }
 0x377   :  { %v1689_v11 = vpop.f32.mrb[34].mxu1  ;;  %2650 = vpow2.f32 %v1784_v16  ;;  %v1752_v8 = vmin.f32 %v4272_v5, 20.0  ;;  %v1751_v54 = vmin.f32 %v4334_v40, 20.0  ;;  %vm1724_vm8 = vcmp.gt.f32.partialorder %v4272_v5, 20.0 }
 0x378   :  { %v4274_v39 = vpop.f32.mrb[35].mxu1  ;;  %v4276_v32 = vpop.f32.mrb[36].mxu0  ;;  %v1788_v18 = vmul.f32 1.442695, %v1750_v23  ;;  %v4287_v34 = vadd.f32 %v1689_v11, %v4266_v13 }
 0x379   :  { %v4278_v6 = vpop.eup %2642  ;;  %v4283_v7 = vpop.f32.mrb[37].mxu0  ;;  %v1792_v60 = vmul.f32 1.442695, %v1752_v8 }
 0x37a   :  { %v1824_v36 = vadd.f32 1.0, %v4278_v6  ;;  %2652 = vpow2.f32 %v1788_v18  ;;  %v1754_v41 = vmin.f32 %v4287_v34, 20.0  ;;  %v1827_v22 = vmul.f32 -0.5, %v4278_v6 }
 0x37b   :  { %v4290_v61 = vpop.f32.mrb[36].mxu1  ;;  %v1830_v9 = vand.u32 2147483647, %v4278_v6  ;;  %v4350_v18 = vmul.f32 1.442695, %v1749_v14 }
 0x37c   :  { %v4292_v20 = vpop.eup %2644  ;;  %2654 = vlog2.f32 %v1824_v36  ;;  %v4295_v43 = vpop.f32.mrb[37].mxu1  ;;  %v1796_v45 = vmul.f32 1.442695, %v1754_v41  ;;  %v1828_v56 = vadd.f32 1.0, %v1827_v22 }
 0x37d   :  { %v4297_v21 = vpop.f32.mrb[38].mxu0  ;;  %v1842_v52 = vadd.f32 1.0, %v4292_v20  ;;  %v4303_v29 = vpop.eup %2646  ;;  %2656 = vpow2.f32 %v1770_v25  ;;  %v1845_v15 = vmul.f32 -0.5, %v4292_v20  ;;  %v1848_v23 = vand.u32 2147483647, %v4292_v20 }
 0x37e   :  { %v4301_v50 = vpop.f32.mrb[39].mxu0  ;;  %v1860_v33 = vadd.f32 1.0, %v4303_v29  ;;  %v1863_v49 = vmul.f32 -0.5, %v4303_v29  ;;  %v1866_v16 = vand.u32 2147483647, %v4303_v29  ;;  %v4354_v25 = vpop.permute.xlu0 %1452 }
 0x37f   :  { %2658 = vlog2.f32 %v1842_v52  ;;  %v4313_v2 = vpop.f32.mrb[38].mxu1  ;;  %v1846_v11 = vadd.f32 1.0, %v1845_v15  ;;  %vm4360_vm1 = vcmp.lt.f32.partialorder %v1830_v9, 0.0004427343  ;;  %vm4375_vm2 = vcmp.lt.f32.partialorder %v1848_v23, 0.0004427343 }
 0x380   :  { %v4315_v38 = vpop.eup %2648  ;;  %2660 = vpow2.f32 %v1792_v60  ;;  %v4317_v57 = vpop.f32.mrb[39].mxu1  ;;  %v1864_v10 = vadd.f32 1.0, %v1863_v49  ;;  %vm4380_vm4 = vcmp.lt.f32.partialorder %v1866_v16, 0.0004427343 }
 0x381   :  { %2662 = vlog2.f32 %v1860_v33  ;;  %v1878_v58 = vadd.f32 1.0, %v4315_v38  ;;  %v4320_v12 = vpop.f32.mrb[40].mxu0  ;;  %v4330_v46 = vpop.eup %2650  ;;  %v1881_v30 = vmul.f32 -0.5, %v4315_v38  ;;  %v1884_v52 = vand.u32 2147483647, %v4315_v38 }
 0x382   :  { %2664 = vpow2.f32 %v1796_v45  ;;  %v4324_v31 = vpop.f32.mrb[41].mxu0  ;;  %v1896_v62 = vadd.f32 1.0, %v4330_v46  ;;  %v4370_v45 = vadd.f32 %v4276_v32, %v4354_v25  ;;  %v1847_v14 = vmul.f32 %v4292_v20, %v1846_v11 }
 0x383   :  { %2666 = vlog2.f32 %v1878_v58  ;;  %v4328_v63 = vpop.f32.mrb[40].mxu1  ;;  %v1882_v33 = vadd.f32 1.0, %v1881_v30  ;;  %v1899_v32 = vmul.f32 -0.5, %v4330_v46  ;;  %vm4391_vm5 = vcmp.lt.f32.partialorder %v1884_v52, 0.0004427343 }
 0x384   :  { %2668 = vpow2.f32 %v1774_v59  ;;  %v4336_v42 = vpop.f32.mrb[41].mxu1  ;;  %v4338_v53 = vpop.eup %2652  ;;  %v4366_v59 = vadd.f32 %v4262_v4, %v4266_v13 }
 0x385   :  { %2670 = vpow2.f32 %v1778_v24  ;;  %v1914_v0 = vadd.f32 1.0, %v4338_v53  ;;  %v1829_v24 = vmul.f32 %v4278_v6, %v1828_v56  ;;  %v1883_v23 = vmul.f32 %v4315_v38, %v1882_v33 }
 0x386   :  { %v2655_v48 = vpop.eup %2654  ;;  %2672 = vlog2.f32 %v1896_v62  ;;  %v1865_v62 = vmul.f32 %v4303_v29, %v1864_v10  ;;  %v4406_v10 = vadd.f32 %v4290_v61, %v4354_v25  ;;  %v1900_v41 = vadd.f32 1.0, %v1899_v32 }
 0x387   :  { %v4352_v36 = vpop.eup %2656  ;;  %v1826_v8 = vmul.f32 0.6931472, %v2655_v48  ;;  %2674 = vlog2.f32 %v1914_v0  ;;  %v1756_v0 = vmin.f32 %v4370_v45, 20.0  ;;  %v1917_v33 = vmul.f32 -0.5, %v4338_v53 }
 0x388   :  { %v1902_v32 = vand.u32 2147483647, %v4330_v46  ;;  %v1790_v48 = vmul.f32 1.442695, %v1751_v54 }
 0x389   :  { %v2659_v60 = vpop.eup %2658  ;;  %v1832_v6 = vsel %vm4360_vm1, %v1829_v24, %v1826_v8 }
 0x38a   :  { %v4372_v58 = vpop.eup %2660  ;;  %v1844_v22 = vmul.f32 0.6931472, %v2659_v60  ;;  %v4413_v38 = vsel %vm1712_vm12, %v4236_v26, %v1832_v6  ;;  %v1458_v6 = vpop.permute.xlu1 %1457  ;;  %vm4453_vm9 = vcmp.lt.f32.partialorder %v1902_v32, 0.0004427343 }
 0x38b   :  { %v2663_v15 = vpop.eup %2662  ;;  %v1932_v49 = vadd.f32 1.0, %v4372_v58  ;;  %v4511_v54 = vadd.f32 %v4301_v50, %v1458_v6 }
 0x38c   :  { %v4386_v9 = vpop.eup %2664  ;;  %v1862_v30 = vmul.f32 0.6931472, %v2663_v15  ;;  %v1850_v56 = vsel %vm4375_vm2, %v1847_v14, %v1844_v22  ;;  %v1935_v22 = vmul.f32 -0.5, %v4372_v58  ;;  %v1800_v14 = vmul.f32 1.442695, %v1756_v0 }
 0x38d   :  { %v2667_v20 = vpop.eup %2666  ;;  %2676 = vlog2.f32 %v1932_v49  ;;  %v1950_v29 = vadd.f32 1.0, %v4386_v9  ;;  %v4429_v26 = vsel %vm1714_vm14, %v4241_v27, %v1850_v56  ;;  %v1953_v15 = vmul.f32 -0.5, %v4386_v9 }
 0x38e   :  { %v4399_v11 = vpop.eup %2668  ;;  %v1868_v16 = vsel %vm4380_vm4, %v1865_v62, %v1862_v30  ;;  %v1880_v8 = vmul.f32 0.6931472, %v2667_v20  ;;  %v1920_v49 = vand.u32 2147483647, %v4338_v53  ;;  %v1758_v27 = vmin.f32 %v4406_v10, 20.0 }
 0x38f   :  { %v4408_v52 = vpop.eup %2670  ;;  %v4418_v60 = vsel %vm1716_vm13, %v4244_v19, %v1868_v16  ;;  %2678 = vlog2.f32 %v1950_v29  ;;  %v1918_v62 = vadd.f32 1.0, %v1917_v33  ;;  %v1936_v20 = vadd.f32 1.0, %v1935_v22 }
 0x390   :  { %v1886_v61 = vsel %vm4391_vm5, %v1883_v23, %v1880_v8  ;;  %v2673_v47 = vpop.eup %2672  ;;  %2680 = vpow2.f32 %v1800_v14  ;;  %v1804_v56 = vmul.f32 1.442695, %v1758_v27  ;;  %v4444_v23 = vadd.f32 %v4297_v21, %v1458_v6 }
 0x391   :  { %v4434_v19 = vsel %vm1718_vm15, %v4249_v17, %v1886_v61  ;;  %v1898_v30 = vmul.f32 0.6931472, %v2673_v47  ;;  %v2675_v17 = vpop.eup %2674  ;;  %v4447_v0 = vadd.f32 %v4313_v2, %v1458_v6  ;;  %v1901_v16 = vmul.f32 %v4330_v46, %v1900_v41 }
 0x392   :  { %v1938_v8 = vand.u32 2147483647, %v4372_v58  ;;  %v1954_v29 = vadd.f32 1.0, %v1953_v15  ;;  %vm4457_vm10 = vcmp.lt.f32.partialorder %v1920_v49, 0.0004427343  ;;  %v4463_v21 = vadd.f32 %v4274_v39, %v4266_v13 }
 0x393   :  { %2682 = vpow2.f32 %v1804_v56  ;;  %v1904_v46 = vsel %vm4453_vm9, %v1901_v16, %v1898_v30  ;;  %v1916_v41 = vmul.f32 0.6931472, %v2675_v17  ;;  %v1919_v61 = vmul.f32 %v4338_v53, %v1918_v62 }
 0x394   :  { %v1760_v22 = vmin.f32 %v4444_v23, 20.0  ;;  %v1937_v15 = vmul.f32 %v4372_v58, %v1936_v20  ;;  %v1956_v14 = vand.u32 2147483647, %v4386_v9  ;;  %v1762_v32 = vmin.f32 %v4447_v0, 20.0 }
 0x395   :  { %vm1939_vm11 = vcmp.lt.f32.partialorder %v1938_v8, 0.0004427343  ;;  %v1955_v13 = vmul.f32 %v4386_v9, %v1954_v29  ;;  %v4475_v39 = vadd.f32 %v4283_v7, %v4354_v25  ;;  %v4480_v53 = vsel %vm1720_vm6, %v4257_v37, %v1904_v46 }
 0x396   :  { %v1808_v49 = vmul.f32 1.442695, %v1760_v22  ;;  %v4484_v58 = vadd.f32 %v4295_v43, %v4354_v25  ;;  %v1812_v62 = vmul.f32 1.442695, %v1762_v32  ;;  %v1922_v9 = vsel %vm4457_vm10, %v1919_v61, %v1916_v41  ;;  %v1463_v41 = vpop.permute.xlu0 %1462 }
 0x397   :  { %v2677_v2 = vpop.eup %2676  ;;  %vm1957_vm12 = vcmp.lt.f32.partialorder %v1956_v14, 0.0004427343  ;;  %v1753_v20 = vmin.f32 %v4366_v59, 20.0  ;;  %vm1726_vm13 = vcmp.gt.f32.partialorder %v4287_v34, 20.0  ;;  %v1755_v56 = vmin.f32 %v4463_v21, 20.0 }
 0x398   :  { %v1934_v47 = vmul.f32 0.6931472, %v2677_v2  ;;  %2684 = vpow2.f32 %v1808_v49  ;;  %v1757_v16 = vmin.f32 %v4475_v39, 20.0  ;;  %v1759_v2 = vmin.f32 %v4484_v58, 20.0 }
 0x399   :  { %v2679_v27 = vpop.eup %2678  ;;  %2686 = vpow2.f32 %v1812_v62  ;;  %v1798_v61 = vmul.f32 1.442695, %v1755_v56  ;;  %vm1728_vm15 = vcmp.gt.f32.partialorder %v4370_v45, 20.0  ;;  %vm1732_vm1 = vcmp.gt.f32.partialorder %v4444_v23, 20.0 }
 0x39a   :  { %v1940_v30 = vsel %vm1939_vm11, %v1937_v15, %v1934_v47  ;;  %v1952_v17 = vmul.f32 0.6931472, %v2679_v27  ;;  %v4496_v43 = vpop.eup %2680  ;;  %2688 = vpow2.f32 %v4346_v55  ;;  %v4525_v55 = vadd.f32 %v4320_v12, %v1463_v41 }
 0x39b   :  { %v4491_v7 = vsel %vm1724_vm8, %v4272_v5, %v1940_v30  ;;  %v4504_v5 = vsel %vm1722_vm7, %v4260_v51, %v1922_v9  ;;  %v1968_v29 = vadd.f32 1.0, %v4496_v43  ;;  %2690 = vpow2.f32 %v4350_v18 }
 0x39c   :  { %v1958_v25 = vsel %vm1957_vm12, %v1955_v13, %v1952_v17  ;;  %v1794_v51 = vmul.f32 1.442695, %v1753_v20  ;;  %2692 = vpow2.f32 %v1790_v48  ;;  %v1802_v22 = vmul.f32 1.442695, %v1757_v16 }
 0x39d   :  { %v4507_v8 = vsel %vm1726_vm13, %v4287_v34, %v1958_v25  ;;  %v4517_v46 = vpop.eup %2682  ;;  %v4521_v34 = vadd.f32 %v4317_v57, %v1458_v6  ;;  %2694 = vlog2.f32 %v1968_v29  ;;  %v1761_v47 = vmin.f32 %v4511_v54, 20.0 }
 0x39e   :  { %v1986_v50 = vadd.f32 1.0, %v4517_v46  ;;  %v1806_v15 = vmul.f32 1.442695, %v1759_v2  ;;  %v1764_v57 = vmin.f32 %v4525_v55, 20.0  ;;  %v4533_v6 = vadd.f32 %v4328_v63, %v1463_v41 }
 0x39f   :  { %v1763_v18 = vmin.f32 %v4521_v34, 20.0  ;;  %v1971_v12 = vmul.f32 -0.5, %v4496_v43  ;;  %v1810_v13 = vmul.f32 1.442695, %v1761_v47  ;;  %v1989_v49 = vmul.f32 -0.5, %v4517_v46 }
 0x3a0   :  { %2696 = vlog2.f32 %v1986_v50  ;;  %4993 = vst [vmem:[#allocation2_spill] sm:$0xff] %v4533_v6  ;;  %v1833_v30 = vadd.f32 1.0, %v4352_v36  ;;  %v1974_v62 = vand.u32 2147483647, %v4496_v43  ;;  %v1816_v17 = vmul.f32 1.442695, %v1764_v57 }
 0x3a1   :  { %2698 = vpow2.f32 %v1794_v51  ;;  %v1814_v63 = vmul.f32 1.442695, %v1763_v18  ;;  %v1766_v20 = vmin.f32 %v4533_v6, 20.0  ;;  %v4547_v25 = vadd.f32 %v4324_v31, %v1463_v41 }
 0x3a2   :  { %v4529_v14 = vpop.eup %2684  ;;  %2700 = vpow2.f32 %v1798_v61  ;;  %v1972_v16 = vadd.f32 1.0, %v1971_v12  ;;  %v1992_v29 = vand.u32 2147483647, %v4517_v46  ;;  %v1990_v51 = vadd.f32 1.0, %v1989_v49 }
 0x3a3   :  { %v4535_v48 = vpop.eup %2686  ;;  %2702 = vpow2.f32 %v1802_v22  ;;  %v2004_v32 = vadd.f32 1.0, %v4529_v14  ;;  %4994 = vst [vmem:[#allocation4_spill] sm:$0xff] %v4547_v25  ;;  %v2007_v61 = vmul.f32 -0.5, %v4529_v14  ;;  %vm4555_vm14 = vcmp.lt.f32.partialorder %v1974_v62, 0.0004427343 }
 0x3a4   :  { %2704 = vpow2.f32 %v1806_v15  ;;  %v2022_v27 = vadd.f32 1.0, %v4535_v48  ;;  %v4543_v9 = vpop.eup %2688  ;;  %v2025_v31 = vmul.f32 -0.5, %v4535_v48  ;;  %v1869_v47 = vadd.f32 1.0, %v4408_v52 }
 0x3a5   :  { %2706 = vlog2.f32 %v2004_v32  ;;  %v4549_v56 = vpop.eup %2690  ;;  %v2010_v18 = vand.u32 2147483647, %v4529_v14  ;;  %v1820_v57 = vmul.f32 1.442695, %v1766_v20  ;;  %v1765_v12 = vmin.f32 %v4547_v25, 20.0 }
 0x3a6   :  { %2708 = vlog2.f32 %v2022_v27  ;;  %v4552_v2 = vpop.eup %2692  ;;  %vm1730_vm2 = vcmp.gt.f32.partialorder %v4406_v10, 20.0  ;;  %vm4569_vm4 = vcmp.lt.f32.partialorder %v1992_v29, 0.0004427343  ;;  %vm1734_vm5 = vcmp.gt.f32.partialorder %v4447_v0, 20.0 }
 0x3a7   :  { %2710 = vpow2.f32 %v1810_v13  ;;  %v2695_v50 = vpop.eup %2694  ;;  %v1973_v13 = vmul.f32 %v4496_v43, %v1972_v16  ;;  %v2028_v27 = vand.u32 2147483647, %v4535_v48  ;;  %v2008_v20 = vadd.f32 1.0, %v2007_v61 }
 0x3a8   :  { %2712 = vlog2.f32 %v1833_v30  ;;  %v4576_v30 = vadd.f32 %v4336_v42, %v1463_v41  ;;  %v1836_v43 = vmul.f32 -0.5, %v4352_v36  ;;  %v2026_v33 = vadd.f32 1.0, %v2025_v31 }
 0x3a9   :  { %2714 = vpow2.f32 %v1814_v63  ;;  %v1970_v63 = vmul.f32 0.6931472, %v2695_v50  ;;  %v1851_v37 = vadd.f32 1.0, %v4399_v11  ;;  %vm4587_vm6 = vcmp.lt.f32.partialorder %v2010_v18, 0.0004427343 }
 0x3aa   :  { %v2697_v15 = vpop.eup %2696  ;;  %2716 = vpow2.f32 %v1816_v17  ;;  %4999 = vst [vmem:[#allocation3_spill] sm:$0xff] %v4576_v30  ;;  %v1991_v17 = vmul.f32 %v4517_v46, %v1990_v51  ;;  %v1818_v41 = vmul.f32 1.442695, %v1765_v12  ;;  %v1839_v46 = vand.u32 2147483647, %v4352_v36 }
 0x3ab   :  { %v4565_v32 = vpop.eup %2698  ;;  %v1988_v29 = vmul.f32 0.6931472, %v2697_v15  ;;  %2718 = vlog2.f32 %v1869_v47  ;;  %vm4592_vm7 = vcmp.lt.f32.partialorder %v2028_v27, 0.0004427343  ;;  %v1767_v50 = vmin.f32 %v4576_v30, 20.0 }
 0x3ac   :  { %v4578_v62 = vpop.eup %2700  ;;  %2720 = vpow2.f32 %v1820_v57  ;;  %v1872_v31 = vmul.f32 -0.5, %v4408_v52  ;;  %v1976_v15 = vsel %vm4555_vm14, %v1973_v13, %v1970_v63  ;;  %v2009_v57 = vmul.f32 %v4529_v14, %v2008_v20 }
 0x3ad   :  { %v4582_v16 = vpop.eup %2702  ;;  %2722 = vlog2.f32 %v1851_v37  ;;  %v1887_v12 = vadd.f32 1.0, %v4543_v9  ;;  %v1994_v27 = vsel %vm4569_vm4, %v1991_v17, %v1988_v29  ;;  %v2027_v30 = vmul.f32 %v4535_v48, %v2026_v33 }
 0x3ae   :  { %v4585_v4 = vpop.eup %2704  ;;  %v1854_v25 = vmul.f32 -0.5, %v4399_v11  ;;  %vm1713_vm8 = vcmp.gt.f32.partialorder %v4251_v1, 20.0  ;;  %vm1717_vm9 = vcmp.gt.f32.partialorder %v4281_v3, 20.0  ;;  %v1837_v22 = vadd.f32 1.0, %v1836_v43 }
 0x3af   :  { %v2707_v51 = vpop.eup %2706  ;;  %v1875_v13 = vand.u32 2147483647, %v4408_v52  ;;  %2724 = vlog2.f32 %v1887_v12  ;;  %v4618_v33 = vsel %vm1728_vm15, %v4370_v45, %v1976_v15  ;;  %v1873_v17 = vadd.f32 1.0, %v1872_v31 }
 0x3b0   :  { %v2709_v47 = vpop.eup %2708  ;;  %v2006_v18 = vmul.f32 0.6931472, %v2707_v51  ;;  %v4632_v43 = vsel %vm1730_vm2, %v4406_v10, %v1994_v27  ;;  %v1890_v42 = vmul.f32 -0.5, %v4543_v9  ;;  %v1905_v51 = vadd.f32 1.0, %v4549_v56 }
 0x3b1   :  { %v4602_v24 = vpop.eup %2710  ;;  %v2024_v6 = vmul.f32 0.6931472, %v2709_v47  ;;  %2726 = vpow2.f32 %v1818_v41  ;;  %v1822_v10 = vmul.f32 1.442695, %v1767_v50  ;;  %v1838_v61 = vmul.f32 %v4352_v36, %v1837_v22 }
 0x3b2   :  { %v2713_v37 = vpop.eup %2712  ;;  %v2012_v14 = vsel %vm4587_vm6, %v2009_v57, %v2006_v18  ;;  %vm4646_vm10 = vcmp.lt.f32.partialorder %v1839_v46, 0.0004427343  ;;  %vm1715_vm11 = vcmp.gt.f32.partialorder %v4269_v35, 20.0  ;;  %v1874_v15 = vmul.f32 %v4408_v52, %v1873_v17 }
 0x3b3   :  { %v4613_v63 = vpop.eup %2714  ;;  %v4623_v48 = vsel %vm1732_vm1, %v4444_v23, %v2012_v14  ;;  %v2030_v49 = vsel %vm4592_vm7, %v2027_v30, %v2024_v6  ;;  %v1835_v23 = vmul.f32 0.6931472, %v2713_v37  ;;  %v1855_v30 = vadd.f32 1.0, %v1854_v25 }
 0x3b4   :  { %v4627_v20 = vpop.eup %2716  ;;  %v2400_v45 = vpack.c.bf16 %v4623_v48, %v4618_v33  ;;  %v4639_v29 = vsel %vm1734_vm5, %v4447_v0, %v2030_v49  ;;  %2728 = vlog2.f32 %v1905_v51  ;;  %v1941_v25 = vadd.f32 1.0, %v4565_v32 }
 0x3b5   :  { %v2412_v6 = vpack.c.bf16 %v4639_v29, %v4632_v43  ;;  %v2719_v47 = vpop.eup %2718  ;;  %v2040_v0 = vadd.f32 1.0, %v4627_v20  ;;  %v1841_v41 = vsel %vm4646_vm10, %v1838_v61, %v1835_v23  ;;  %v1857_v46 = vand.u32 2147483647, %v4399_v11  ;;  %v2109_v43 = vpop.permute.xlu1 %2108 }
 0x3b6   :  { %v4654_v18 = vpop.eup %2720  ;;  %v1871_v36 = vmul.f32 0.6931472, %v2719_v47  ;;  %v1923_v50 = vadd.f32 1.0, %v4552_v2  ;;  %vm1876_vm12 = vcmp.lt.f32.partialorder %v1875_v13, 0.0004427343  ;;  %v1856_v12 = vmul.f32 %v4399_v11, %v1855_v30 }
 0x3b7   :  { %v2723_v57 = vpop.eup %2722  ;;  %v1891_v27 = vadd.f32 1.0, %v1890_v42  ;;  %2730 = vlog2.f32 %v1941_v25  ;;  %v1893_v14 = vand.u32 2147483647, %v4543_v9  ;;  %v1908_v22 = vmul.f32 -0.5, %v4549_v56 }
 0x3b8   :  { %v1877_v52 = vsel %vm1876_vm12, %v1874_v15, %v1871_v36  ;;  %v1853_v37 = vmul.f32 0.6931472, %v2723_v57  ;;  %v2077_v49 = vsel %vm1713_vm8, %v4251_v1, %v1841_v41  ;;  %v1944_v13 = vmul.f32 -0.5, %v4565_v32 }
 0x3b9   :  { %v2081_v17 = vsel %vm1717_vm9, %v4281_v3, %v1877_v52  ;;  %2732 = vlog2.f32 %v1923_v50  ;;  %v2725_v11 = vpop.eup %2724  ;;  %vm1719_vm13 = vcmp.gt.f32.partialorder %v4306_v44, 20.0  ;;  %vm4671_vm14 = vcmp.lt.f32.partialorder %v1857_v46, 0.0004427343 }
 0x3ba   :  { %2734 = vpow2.f32 %v1822_v10  ;;  %v2390_v23 = vpack.c.bf16 %v2081_v17, %v2077_v49  ;;  %v1859_v1 = vsel %vm4671_vm14, %v1856_v12, %v1853_v37  ;;  %v1889_v42 = vmul.f32 0.6931472, %v2725_v11 }
 0x3bb   :  { %2736 = vlog2.f32 %v2040_v0  ;;  %v1892_v51 = vmul.f32 %v4543_v9, %v1891_v27  ;;  %vm1721_vm15 = vcmp.gt.f32.partialorder %v4311_v28, 20.0  ;;  %vm1725_vm1 = vcmp.gt.f32.partialorder %v4366_v59, 20.0  ;;  %v4687_v25 = vpop.eup %2726 }
 0x3bc   :  { %2391 = vmatprep.subr.bf16.mxu0 %v2390_v23  ;;  %vm1894_vm2 = vcmp.lt.f32.partialorder %v1893_v14, 0.0004427343  ;;  %v1909_v3 = vadd.f32 1.0, %v1908_v22  ;;  %v1911_v10 = vand.u32 2147483647, %v4549_v56  ;;  %v1959_v61 = vadd.f32 1.0, %v4578_v62 }
 0x3bd   :  { %v1895_v31 = vsel %vm1894_vm2, %v1892_v51, %v1889_v42  ;;  %v5008_v47 = vpack.c.bf16 %v4418_v60, %v4413_v38  ;;  %v1945_v0 = vadd.f32 1.0, %v1944_v13  ;;  %v1947_v15 = vand.u32 2147483647, %v4565_v32 }
 0x3be   :  { %v1977_v9 = vadd.f32 1.0, %v4582_v16  ;;  %v4690_v41 = vmul.f32 -0.5, %v4627_v20  ;;  %v2079_v36 = vsel %vm1715_vm11, %v4269_v35, %v1859_v1  ;;  %v2083_v46 = vsel %vm1719_vm13, %v4306_v44, %v1895_v31  ;;  %v2729_v38 = vpop.eup %2728 }
 0x3bf   :  { %2393 = vmatpush1.bf16.msra.mxu0 %v5008_v47  ;;  %2738 = vlog2.f32 %v1959_v61  ;;  %v2058_v60 = vadd.f32 1.0, %v4654_v18  ;;  %v2402_v50 = vpack.c.bf16 %v2083_v46, %v2079_v36  ;;  %v1926_v57 = vmul.f32 -0.5, %v4552_v2 }
 0x3c0   :  { %2740 = vlog2.f32 %v1977_v9  ;;  %v1907_v12 = vmul.f32 0.6931472, %v2729_v38  ;;  %v1910_v27 = vmul.f32 %v4549_v56, %v1909_v3  ;;  %v1962_v52 = vmul.f32 -0.5, %v4578_v62 }
 0x3c1   :  { %v2013_v37 = vadd.f32 1.0, %v4602_v24  ;;  %v2731_v35 = vpop.eup %2730  ;;  %2403 = vmatprep.subr.bf16.mxu1 %v2402_v50  ;;  %vm4703_vm4 = vcmp.lt.f32.partialorder %v1911_v10, 0.0004427343  ;;  %v1946_v44 = vmul.f32 %v4565_v32, %v1945_v0  ;;  %vm4708_vm5 = vcmp.lt.f32.partialorder %v1947_v15, 0.0004427343 }
 0x3c2   :  { %v1995_v49 = vadd.f32 1.0, %v4585_v4  ;;  %v5013_v56 = vpack.c.bf16 %v4434_v19, %v4429_v26  ;;  %v1913_v17 = vsel %vm4703_vm4, %v1910_v27, %v1907_v12  ;;  %v1943_v13 = vmul.f32 0.6931472, %v2731_v35 }
 0x3c3   :  { %v1980_v11 = vmul.f32 -0.5, %v4582_v16  ;;  %2742 = vlog2.f32 %v2013_v37  ;;  %v2733_v23 = vpop.eup %2732  ;;  %vm1723_vm6 = vcmp.gt.f32.partialorder %v4334_v40, 20.0  ;;  %vm1727_vm7 = vcmp.gt.f32.partialorder %v4463_v21, 20.0 }
 0x3c4   :  { %2405 = vmatpush1.bf16.msra.mxu1 %v5013_v56  ;;  %v1927_v32 = vadd.f32 1.0, %v1926_v57  ;;  %v1929_v30 = vand.u32 2147483647, %v4552_v2  ;;  %v1965_v1 = vand.u32 2147483647, %v4578_v62  ;;  %v2016_v26 = vmul.f32 -0.5, %v4602_v24  ;;  %v4724_v19 = vpop.eup %2734 }
 0x3c5   :  { %v1949_v42 = vsel %vm4708_vm5, %v1946_v44, %v1943_v13  ;;  %v1963_v51 = vadd.f32 1.0, %v1962_v52  ;;  %v1983_v3 = vand.u32 2147483647, %v4582_v16  ;;  %2744 = vlog2.f32 %v1995_v49  ;;  %v2737_v10 = vpop.eup %2736 }
 0x3c6   :  { %v2085_v61 = vsel %vm1721_vm15, %v4311_v28, %v1913_v17  ;;  %v2089_v31 = vsel %vm1725_vm1, %v4366_v59, %v1949_v42  ;;  %v1925_v47 = vmul.f32 0.6931472, %v2733_v23  ;;  %v2031_v0 = vadd.f32 1.0, %v4613_v63 }
 0x3c7   :  { %v2046_v15 = vand.u32 2147483647, %v4627_v20  ;;  %2746 = vlog2.f32 %v2058_v60  ;;  %v2394_v9 = vpack.c.bf16 %v2089_v31, %v2085_v61  ;;  %v1981_v36 = vadd.f32 1.0, %v1980_v11 }
 0x3c8   :  { %vm1729_vm8 = vcmp.gt.f32.partialorder %v4475_v39, 20.0  ;;  %vm1733_vm9 = vcmp.gt.f32.partialorder %v4511_v54, 20.0  ;;  %v1928_v46 = vmul.f32 %v4552_v2, %v1927_v32  ;;  %v2017_v38 = vadd.f32 1.0, %v2016_v26 }
 0x3c9   :  { %v1998_v28 = vmul.f32 -0.5, %v4585_v4  ;;  %2748 = vlog2.f32 %v2031_v0  ;;  %v2739_v50 = vpop.eup %2738  ;;  %2395 = vmatprep.subr.bf16.mxu0 %v2394_v9  ;;  %vm4741_vm10 = vcmp.lt.f32.partialorder %v1929_v30, 0.0004427343  ;;  %v1964_v60 = vmul.f32 %v4578_v62, %v1963_v51 }
 0x3ca   :  { %vm4746_vm11 = vcmp.lt.f32.partialorder %v1965_v1, 0.0004427343  ;;  %v2049_v12 = vadd.f32 1.0, %v4687_v25  ;;  %v2741_v27 = vpop.eup %2740  ;;  %v1931_v2 = vsel %vm4741_vm10, %v1928_v46, %v1925_v47  ;;  %v1961_v52 = vmul.f32 0.6931472, %v2739_v50 }
 0x3cb   :  { %v5018_v37 = vpack.c.bf16 %v4491_v7, %v4480_v53  ;;  %vm4756_vm12 = vcmp.lt.f32.partialorder %v1983_v3, 0.0004427343  ;;  %v2019_v62 = vand.u32 2147483647, %v4602_v24  ;;  %v1979_v14 = vmul.f32 0.6931472, %v2741_v27 }
 0x3cc   :  { %v1982_v44 = vmul.f32 %v4582_v16, %v1981_v36  ;;  %v2034_v22 = vmul.f32 -0.5, %v4613_v63  ;;  %2750 = vlog2.f32 %v2049_v12  ;;  %v1967_v49 = vsel %vm4746_vm11, %v1964_v60, %v1961_v52 }
 0x3cd   :  { %2397 = vmatpush1.bf16.msra.mxu0 %v5018_v37  ;;  %v2018_v56 = vmul.f32 %v4602_v24, %v2017_v38  ;;  %v1999_v17 = vadd.f32 1.0, %v1998_v28  ;;  %v2067_v53 = vadd.f32 1.0, %v4724_v19  ;;  %v2743_v7 = vpop.eup %2742  ;;  %vm1731_vm13 = vcmp.gt.f32.partialorder %v4484_v58, 20.0 }
 0x3ce   :  { %vm1735_vm14 = vcmp.gt.f32.partialorder %v4521_v34, 20.0  ;;  %v2087_v16 = vsel %vm1723_vm6, %v4334_v40, %v1931_v2  ;;  %v2091_v13 = vsel %vm1727_vm7, %v4463_v21, %v1967_v49  ;;  %v2001_v11 = vand.u32 2147483647, %v4585_v4 }
 0x3cf   :  { %v2052_v24 = vmul.f32 -0.5, %v4687_v25  ;;  %v2406_v23 = vpack.c.bf16 %v2091_v13, %v2087_v16  ;;  %v1985_v32 = vsel %vm4756_vm12, %v1982_v44, %v1979_v14  ;;  %v2015_v30 = vmul.f32 0.6931472, %v2743_v7  ;;  %v2745_v1 = vpop.eup %2744 }
 0x3d0   :  { %2752 = vlog2.f32 %v2067_v53  ;;  %v2044_v26 = vadd.f32 1.0, %v4690_v41  ;;  %v2061_v42 = vmul.f32 -0.5, %v4654_v18  ;;  %vm2020_vm15 = vcmp.lt.f32.partialorder %v2019_v62, 0.0004427343 }
 0x3d1   :  { %v2035_v40 = vadd.f32 1.0, %v2034_v22  ;;  %2407 = vmatprep.subr.bf16.mxu1 %v2406_v23  ;;  %v2021_v51 = vsel %vm2020_vm15, %v2018_v56, %v2015_v30  ;;  %v1997_v21 = vmul.f32 0.6931472, %v2745_v1  ;;  %v2000_v3 = vmul.f32 %v4585_v4, %v1999_v17  ;;  %v2747_v31 = vpop.eup %2746  ;;  %v2104_v22 = vld [vmem:[%s4862_s7] sm:$0x7]  ;;  %v5029_v56 = vld [vmem:[#allocation3_spill] sm:$0xff] }
 0x3d2   :  { %v2037_v61 = vand.u32 2147483647, %v4613_v63  ;;  %v5021_v47 = vpack.c.bf16 %v4507_v8, %v4504_v5  ;;  %v2093_v41 = vsel %vm1729_vm8, %v4475_v39, %v1985_v32  ;;  %v2097_v0 = vsel %vm1733_vm9, %v4511_v54, %v2021_v51 }
 0x3d3   :  { %v2053_v9 = vadd.f32 1.0, %v2052_v24  ;;  %v2070_v36 = vmul.f32 -0.5, %v4724_v19  ;;  %v2749_v46 = vpop.eup %2748  ;;  %v2042_v4 = vmul.f32 0.6931472, %v2737_v10  ;;  %vm4793_vm1 = vcmp.lt.f32.partialorder %v2046_v15, 0.0004427343 }
 0x3d4   :  { %2409 = vmatpush1.bf16.msra.mxu1 %v5021_v47  ;;  %v2398_v28 = vpack.c.bf16 %v2097_v0, %v2093_v41  ;;  %vm4797_vm2 = vcmp.lt.f32.partialorder %v2001_v11, 0.0004427343  ;;  %v2033_v8 = vmul.f32 0.6931472, %v2749_v46  ;;  %v2036_v54 = vmul.f32 %v4613_v63, %v2035_v40 }
 0x3d5   :  { %v2003_v39 = vsel %vm4797_vm2, %v2000_v3, %v1997_v21  ;;  %v2055_v50 = vand.u32 2147483647, %v4687_v25  ;;  %v2045_v59 = vmul.f32 %v4627_v20, %v2044_v26  ;;  %v2062_v10 = vadd.f32 1.0, %v2061_v42 }
 0x3d6   :  { %v2064_v15 = vand.u32 2147483647, %v4654_v18  ;;  %2399 = vmatprep.subr.bf16.mxu0 %v2398_v28  ;;  %vm2038_vm4 = vcmp.lt.f32.partialorder %v2037_v61, 0.0004427343  ;;  %v2751_v60 = vpop.eup %2750  ;;  %v2060_v57 = vmul.f32 0.6931472, %v2747_v31  ;;  %v2054_v27 = vmul.f32 %v4687_v25, %v2053_v9 }
 0x3d7   :  { %v2039_v12 = vsel %vm2038_vm4, %v2036_v54, %v2033_v8  ;;  %2401 = vmatpush1.bf16.msra.mxu0 %v2400_v45  ;;  %v2071_v2 = vadd.f32 1.0, %v2070_v36  ;;  %v2095_v63 = vsel %vm1731_vm13, %v4484_v58, %v2003_v39  ;;  %v2051_v52 = vmul.f32 0.6931472, %v2751_v60  ;;  %v5026_v45 = vld [vmem:[#allocation4_spill] sm:$0xff] }
 0x3d8   :  { %v2099_v20 = vsel %vm1735_vm14, %v4521_v34, %v2039_v12  ;;  %v2073_v37 = vand.u32 2147483647, %v4724_v19  ;;  %v2048_v35 = vsel %vm4793_vm1, %v2045_v59, %v2042_v4  ;;  %vm2056_vm5 = vcmp.lt.f32.partialorder %v2055_v50, 0.0004427343 }
 0x3d9   :  { %v2410_v62 = vpack.c.bf16 %v2099_v20, %v2095_v63  ;;  %vm1736_vm6 = vcmp.gt.f32.partialorder %v4525_v55, 20.0  ;;  %v2063_v48 = vmul.f32 %v4654_v18, %v2062_v10  ;;  %vm1737_vm7 = vcmp.gt.f32.partialorder %v5026_v45, 20.0 }
 0x3da   :  { %v2753_v33 = vpop.eup %2752  ;;  %v2057_v58 = vsel %vm2056_vm5, %v2054_v27, %v2051_v52  ;;  %vm4823_vm8 = vcmp.lt.f32.partialorder %v2064_v15, 0.0004427343  ;;  %v2072_v44 = vmul.f32 %v4724_v19, %v2071_v2  ;;  %v2100_v49 = vsel %vm1736_vm6, %v4525_v55, %v2048_v35  ;;  %v5030_v19 = vld [vmem:[#allocation2_spill] sm:$0xff] }
 0x3db   :  { %2411 = vmatprep.subr.bf16.mxu1 %v2410_v62  ;;  %v2101_v34 = vsel %vm1737_vm7, %v5026_v45, %v2057_v58  ;;  %v2069_v14 = vmul.f32 0.6931472, %v2753_v33  ;;  %v2066_v18 = vsel %vm4823_vm8, %v2063_v48, %v2060_v57  ;;  %vm2074_vm9 = vcmp.lt.f32.partialorder %v2073_v37, 0.0004427343 }
 0x3dc   :  { %2413 = vmatpush1.bf16.msra.mxu1 %v2412_v6  ;;  %2336 = vmatprep.subr.msk.mxu0 %vm797_vm0, %v2101_v34  ;;  %vm1739_vm10 = vcmp.gt.f32.partialorder %v5029_v56, 20.0  ;;  %vm1738_vm11 = vcmp.gt.f32.partialorder %v5030_v19, 20.0 }
 0x3dd   :  { %v2075_v17 = vsel %vm2074_vm9, %v2072_v44, %v2069_v14  ;;  %2337 = vmatpush1.msk.msra.mxu0 %vm797_vm0, %v2100_v49  ;;  %v2102_v55 = vsel %vm1738_vm11, %v5030_v19, %v2066_v18 }
 0x3de   :  { %v2103_v53 = vsel %vm1739_vm10, %v5029_v56, %v2075_v17  ;;  %2338 = vmatmul.mubr.msk.f32.vlgmr.msra.gmra.mrb[42].mxu0 %vm775_vm3, %v2104_v22 }
 0x3df   :  { %2339 = vmatprep.subr.msk.mxu1 %vm797_vm0, %v2103_v53 }
 0x3e0   :  { %2340 = vmatpush1.msk.msra.mxu1 %vm797_vm0, %v2102_v55 }
 0x3e1   :  { %2341 = vmatmul.mubr.msk.f32.vlgmr.msra.gmra.mrb[42].mxu1 %vm775_vm3, %v2104_v22 }
 0x4b1   :  { %v2192_v29 = vpop.f32.mrb[42].mxu0 }
 0x4b2   :  { %v2193_v6 = vadd.f32 %v2192_v29, %v2109_v43  ;;  %v2194_v7 = vpop.f32.mrb[43].mxu0 }
 0x4b3   :  { %v2195_v16 = vadd.f32 %v2194_v7, %v2109_v43 }
 0x4b4   :  { %v2263_v13 = vpop.f32.mrb[42].mxu1 }
 0x4b5   :  { %v2264_v11 = vadd.f32 %v2263_v13, %v2109_v43  ;;  %v2272_v24 = vcombine.low %v2193_v6, %v2195_v16  ;;  %v2265_v23 = vpop.f32.mrb[43].mxu1 }
 0x4b6   :  { %v2266_v32 = vadd.f32 %v2265_v23, %v2109_v43 }
 0x4b7   :  { %2276 = vst [vmem:[%s4863_s9] sm:$0x77] %v2272_v24 }
 0x4b8   :  { %v2273_v30 = vcombine.low %v2264_v11, %v2266_v32 }
 0x4ba   :  { %2277 = vst [vmem:[%s4863_s9 + $0x8] sm:$0x77] %v2273_v30 }

</bundles_post_ra>
